<compile_context>
chip_gen: v7x
topology: tpu7x:2x2x1
jax: 0.10.0
libtpu: 0.0.40
codegen_flags: <defaults>
</compile_context>

<pallas_src>
import functools

import jax
import jax.numpy as jnp
from jax import lax
from jax.experimental import pallas as pl
from jax.experimental.pallas import tpu as pltpu

LANE = 128
SUBLANE = 8
_FULL_UNROLL_SEQ = 32   # fully unroll the timestep loop up to this seq_len


def _round_up(x, m):
  return (x + m - 1) // m * m


# ----------------------------------------------------------------------------
# Fused Pallas kernel: multi-layer LSTM + classifier head, grid = (num_layers,)
# ----------------------------------------------------------------------------
def _make_lstm_stack_kernel(hidden_size, seq_len, feat_dim):
  """Builds the kernel with static hidden/seq/feature sizes baked in.

  Refs (grid = (L,), all "arbitrary"/sequential):
    xin_ref   : (S, B, F)  embedded tokens, bf16 (constant block -> DMA'd once)
    h0_ref    : (B, H)     initial hidden state of layer l, f32
    c0_ref    : (B, H)     initial cell state of layer l, f32
    wx_ref    : (F, G)     W_ih^T of layer l, gates packed in 4H lanes, bf16
    wh_ref    : (H, G)     W_hh^T of layer l, bf16
    b_ref     : (1, G)     b_ih + b_hh of layer l, f32
    fcw_ref   : (H, Cp)    classifier weight, bf16
    fcb_ref   : (1, Cp)    classifier bias, f32
    logits_ref: (B, Cp)    output logits, f32 (written once, last layer)
    xbuf      : (S, B, F)  VMEM activation ring (layer l's input sequence)
  """
  H = hidden_size
  S = seq_len
  F = feat_dim

  def kernel(xin_ref, h0_ref, c0_ref, wx_ref, wh_ref, b_ref, fcw_ref, fcb_ref,
             logits_ref, xbuf):
    l = pl.program_id(0)
    num_layers = pl.num_programs(0)

    # Layer 0's input is the embedded token sequence: one bulk VMEM->VMEM copy
    # into the activation ring (off the per-timestep critical path).
    @pl.when(l == 0)
    def _():
      xbuf[...] = xin_ref[...]

    wx = wx_ref[...]                      # (F, G) bf16
    wh = wh_ref[...]                      # (H, G) bf16
    b = b_ref[...]                        # (1, G) f32

    def step(t, carry):
      h, c = carry                        # (B, H) f32 — carried in vregs
      x_t = xbuf[t]                       # (B, F) bf16

      # Two small matmuls (no concat staging buffer); f32 accumulation.
      gates = (jnp.dot(x_t, wx, preferred_element_type=jnp.float32)
               + jnp.dot(h.astype(wh.dtype), wh,
                         preferred_element_type=jnp.float32)
               + b)                       # (B, G) f32, lanes [0, 4H) valid

      # PyTorch gate order [i, f, g, o]; tight static H-lane sub-slices.
      i_g = jax.nn.sigmoid(gates[:, 0 * H:1 * H])
      f_g = jax.nn.sigmoid(gates[:, 1 * H:2 * H])
      g_g = jnp.tanh(gates[:, 2 * H:3 * H])
      o_g = jax.nn.sigmoid(gates[:, 3 * H:4 * H])

      c_new = f_g * c + i_g * g_g
      h_new = o_g * jnp.tanh(c_new)

      h_bf = h_new.astype(xbuf.dtype)
      if F > H:                           # static (trace-time) branch
        h_bf = jnp.pad(h_bf, ((0, 0), (0, F - H)))
      xbuf[t] = h_bf                      # becomes layer l+1's input at time t
      return h_new, c_new

    h0 = h0_ref[...]
    c0 = c0_ref[...]
    if S <= _FULL_UNROLL_SEQ:
      # Full static unroll: maximal scheduler visibility, h/c stay in vregs.
      h, c = h0, c0
      for t in range(S):
        h, c = step(t, (h, c))
      h_final = h
    else:
      h_final, _ = lax.fori_loop(0, S, step, (h0, c0), unroll=8)

    # Fused classifier head on the last layer's final hidden state.
    @pl.when(l == num_layers - 1)
    def _():
      logits_ref[...] = (
          jnp.dot(h_final.astype(fcw_ref.dtype), fcw_ref[...],
                  preferred_element_type=jnp.float32)
          + fcb_ref[...]).astype(logits_ref.dtype)

  return kernel


def lstm_stack_pallas(xin, h0, c0, wx, wh, b, fc_w, fc_b):
  """xin: (S, B, F) bf16; h0/c0: (L, B, H) f32; wx: (L, F, G) bf16;
  wh: (L, H, G) bf16; b: (L, 1, G) f32; fc_w: (H, Cp) bf16; fc_b: (1, Cp) f32."""
  S, B, F = xin.shape
  L, _, H = h0.shape
  G = wx.shape[-1]
  Cp = fc_w.shape[-1]

  kernel = _make_lstm_stack_kernel(H, S, F)

  # NOTE: xbuf scratch is S*B*F bf16; for very long sequences on v7x (64 MiB
  # VMEM) chunk the time axis or raise vmem_limit_bytes — trivial at these sizes.
  return pl.pallas_call(
      kernel,
      out_shape=jax.ShapeDtypeStruct((B, Cp), jnp.float32),
      grid_spec=pltpu.PrefetchScalarGridSpec(
          num_scalar_prefetch=0,
          grid=(L,),
          in_specs=[
              # Whole embedded sequence, constant block index -> fetched once.
              pl.BlockSpec((S, B, F), lambda l: (0, 0, 0)),
              pl.BlockSpec((pl.Squeezed(), B, H), lambda l: (l, 0, 0)),
              pl.BlockSpec((pl.Squeezed(), B, H), lambda l: (l, 0, 0)),
              pl.BlockSpec((pl.Squeezed(), F, G), lambda l: (l, 0, 0)),
              pl.BlockSpec((pl.Squeezed(), H, G), lambda l: (l, 0, 0)),
              pl.BlockSpec((pl.Squeezed(), 1, G), lambda l: (l, 0, 0)),
              pl.BlockSpec((H, Cp), lambda l: (0, 0)),
              pl.BlockSpec((1, Cp), lambda l: (0, 0)),
          ],
          out_specs=pl.BlockSpec((B, Cp), lambda l: (0, 0)),
          scratch_shapes=[
              pltpu.VMEM((S, B, F), jnp.bfloat16),   # activation ring
          ],
      ),
      compiler_params=pltpu.CompilerParams(
          dimension_semantics=("arbitrary",)),
  )(xin, h0, c0, wx, wh, b, fc_w, fc_b)


# ----------------------------------------------------------------------------
# Parameters (PyTorch layout) + packed/fused kernel layout
# ----------------------------------------------------------------------------
def init_params(key, num_classes, vocab_size, embedding_dim, hidden_size,
                num_layers):
  keys = jax.random.split(key, 1 + 4 * num_layers + 2)
  it = iter(keys)
  params = {}
  # nn.Embedding default init: N(0, 1)
  params["embedding"] = jax.random.normal(
      next(it), (vocab_size, embedding_dim), dtype=jnp.float32)

  # nn.LSTM default init: U(-1/sqrt(H), 1/sqrt(H)); PyTorch weight layout.
  bound = 1.0 / (hidden_size ** 0.5)
  layers = []
  for layer in range(num_layers):
    in_dim = embedding_dim if layer == 0 else hidden_size
    layers.append({
        "w_ih": jax.random.uniform(next(it), (4 * hidden_size, in_dim),
                                   minval=-bound, maxval=bound,
                                   dtype=jnp.float32),
        "w_hh": jax.random.uniform(next(it), (4 * hidden_size, hidden_size),
                                   minval=-bound, maxval=bound,
                                   dtype=jnp.float32),
        "b_ih": jax.random.uniform(next(it), (4 * hidden_size,),
                                   minval=-bound, maxval=bound,
                                   dtype=jnp.float32),
        "b_hh": jax.random.uniform(next(it), (4 * hidden_size,),
                                   minval=-bound, maxval=bound,
                                   dtype=jnp.float32),
    })
  params["lstm"] = layers

  # nn.Linear(hidden_size, num_classes) default init; (out, in) layout.
  params["fc_w"] = jax.random.uniform(
      next(it), (num_classes, hidden_size), minval=-bound, maxval=bound,
      dtype=jnp.float32)
  params["fc_b"] = jax.random.uniform(
      next(it), (num_classes,), minval=-bound, maxval=bound,
      dtype=jnp.float32)
  return params


def prepare_fused_params(params, num_classes):
  """Pack PyTorch-layout params into the tight fused-kernel layout."""
  emb = params["embedding"]
  E = emb.shape[-1]
  H = params["lstm"][0]["w_hh"].shape[-1]
  F = _round_up(max(E, H), SUBLANE)      # shared x / hidden feature width
  G = _round_up(4 * H, LANE)             # packed gate width (lanes [0,4H) used)
  Cp = _round_up(num_classes, LANE)

  wx_layers, wh_layers, b_layers = [], [], []
  for lp in params["lstm"]:
    in_dim = lp["w_ih"].shape[-1]
    # Gates stay in PyTorch order [i, f, g, o], tightly packed at H lanes each.
    wx = jnp.zeros((F, G), jnp.float32).at[:in_dim, :4 * H].set(lp["w_ih"].T)
    wh = jnp.zeros((H, G), jnp.float32).at[:, :4 * H].set(lp["w_hh"].T)
    bias = jnp.zeros((1, G), jnp.float32).at[0, :4 * H].set(
        lp["b_ih"] + lp["b_hh"])
    wx_layers.append(wx.astype(jnp.bfloat16))
    wh_layers.append(wh.astype(jnp.bfloat16))
    b_layers.append(bias)                 # bias stays f32

  fc_w = jnp.zeros((H, Cp), jnp.float32).at[:, :num_classes].set(
      params["fc_w"].T)
  fc_b = jnp.zeros((1, Cp), jnp.float32).at[0, :num_classes].set(
      params["fc_b"])

  # Pre-pad + pre-cast the embedding table so the per-call gather directly
  # produces the bf16, feature-padded kernel operand.
  emb_p = jnp.zeros((emb.shape[0], F), jnp.float32).at[:, :E].set(emb)

  return {
      "embedding": emb_p.astype(jnp.bfloat16),   # (V, F) bf16
      "wx": jnp.stack(wx_layers),                # (L, F, G) bf16
      "wh": jnp.stack(wh_layers),                # (L, H, G) bf16
      "b": jnp.stack(b_layers),                  # (L, 1, G) f32
      "fc_w": fc_w.astype(jnp.bfloat16),         # (H, Cp) bf16
      "fc_b": fc_b,                              # (1, Cp) f32
  }


def init_hidden_and_cell_state(num_layers, batch_size, hidden_size):
  h0 = jnp.zeros((num_layers, batch_size, hidden_size), jnp.float32)
  c0 = jnp.zeros((num_layers, batch_size, hidden_size), jnp.float32)
  return h0, c0


# ----------------------------------------------------------------------------
# Forward pass
# ----------------------------------------------------------------------------
@functools.partial(jax.jit, static_argnames=("num_classes", "output_activation"))
def text_classification_forward(fused_params, tokens, hidden, *, num_classes,
                                output_activation=None):
  """tokens: (batch, seq) int32 ids; hidden: (h0, c0) each (L, B, H)."""
  h0_all, c0_all = hidden
  B, S = tokens.shape
  B_pad = max(SUBLANE, _round_up(B, SUBLANE))   # fill sublanes / MXU rows
  # TODO(synk): for best MXU utilization batch many requests so B_pad -> 128/256.

  # Embedding lookup: table is already feature-padded bf16 -> single gather.
  x = jnp.take(fused_params["embedding"], tokens, axis=0)     # (B, S, F) bf16
  x = jnp.transpose(x, (1, 0, 2))                             # (S, B, F)
  x = jnp.pad(x, ((0, 0), (0, B_pad - B), (0, 0)))

  h0 = jnp.pad(h0_all.astype(jnp.float32), ((0, 0), (0, B_pad - B), (0, 0)))
  c0 = jnp.pad(c0_all.astype(jnp.float32), ((0, 0), (0, B_pad - B), (0, 0)))

  logits_p = lstm_stack_pallas(x, h0, c0,
                               fused_params["wx"], fused_params["wh"],
                               fused_params["b"],
                               fused_params["fc_w"], fused_params["fc_b"])
  logits = logits_p[:B, :num_classes]

  if output_activation == "softmax":
    logits = jax.nn.softmax(logits, axis=-1)
  # TODO(synk): dropout between LSTM layers is a train-time no-op (eval mode);
  # the module's `bidirectional` flag is not consumed by its inner LSTM
  # signature, so a unidirectional stack is implemented.
  return logits


# ----------------------------------------------------------------------------
# Pure-JAX reference (same bf16 MXU-operand rounding as the kernel)
# ----------------------------------------------------------------------------
def reference_forward(params, tokens, hidden, num_classes,
                      output_activation=None):
  def bf16(v):
    return v.astype(jnp.bfloat16).astype(jnp.float32)

  h0_all, c0_all = hidden
  H = h0_all.shape[-1]
  emb = jnp.take(params["embedding"], tokens, axis=0)
  x_seq = jnp.transpose(emb, (1, 0, 2))                       # (S, B, E) f32
  for layer, lp in enumerate(params["lstm"]):
    w_ih = bf16(lp["w_ih"])
    w_hh = bf16(lp["w_hh"])
    bias = lp["b_ih"] + lp["b_hh"]
    h = h0_all[layer]
    c = c0_all[layer]
    outs = []
    for t in range(x_seq.shape[0]):
      gates = bf16(x_seq[t]) @ w_ih.T + bf16(h) @ w_hh.T + bias
      i = jax.nn.sigmoid(gates[:, 0 * H:1 * H])
      f = jax.nn.sigmoid(gates[:, 1 * H:2 * H])
      g = jnp.tanh(gates[:, 2 * H:3 * H])
      o = jax.nn.sigmoid(gates[:, 3 * H:4 * H])
      c = f * c + i * g
      h = o * jnp.tanh(c)
      outs.append(h)
    x_seq = jnp.stack(outs)
  logits = bf16(x_seq[-1]) @ bf16(params["fc_w"]).T + params["fc_b"]
  if output_activation == "softmax":
    logits = jax.nn.softmax(logits, axis=-1)
  return logits


# ----------------------------------------------------------------------------
# Main
# ----------------------------------------------------------------------------
if __name__ == "__main__":
  num_classes = 4
  vocab_size = 50
  embedding_dim = 32
  hidden_size = 32
  num_layers = 2
  batch = 2
  seq = 8

  key = jax.random.PRNGKey(0)
  k_params, k_tokens = jax.random.split(key)

  params = init_params(k_params, num_classes, vocab_size, embedding_dim,
                       hidden_size, num_layers)
  fused = prepare_fused_params(params, num_classes)
  tokens = jax.random.randint(k_tokens, (batch, seq), 0, vocab_size,
                              dtype=jnp.int32)
  hidden = init_hidden_and_cell_state(num_layers, batch, hidden_size)

  logits = text_classification_forward(fused, tokens, hidden,
                                        num_classes=num_classes)
  jax.block_until_ready(logits)
  assert logits.shape == (batch, num_classes)

  ref = reference_forward(params, tokens, hidden, num_classes)
  assert jnp.allclose(logits, ref, rtol=1e-2, atol=1e-2), (
      f"max abs diff {jnp.max(jnp.abs(logits - ref))}")

  print("KERNEL_OK")
</pallas_src>

<mosaic_0001>
module attributes {stable_mosaic.version = 11 : i64} {
  func.func @kernel(%arg0: i32, %arg1: memref<8x8x32xbf16, #tpu.memory_space<vmem>>, %arg2: memref<1x8x32xf32, #tpu.memory_space<vmem>>, %arg3: memref<1x8x32xf32, #tpu.memory_space<vmem>>, %arg4: memref<1x32x128xbf16, #tpu.memory_space<vmem>>, %arg5: memref<1x32x128xbf16, #tpu.memory_space<vmem>>, %arg6: memref<1x1x128xf32, #tpu.memory_space<vmem>>, %arg7: memref<32x128xbf16, #tpu.memory_space<vmem>>, %arg8: memref<1x128xf32, #tpu.memory_space<vmem>>, %arg9: memref<8x128xf32, #tpu.memory_space<vmem>>, %arg10: memref<8x8x32xbf16, #tpu.memory_space<vmem>>) attributes {dimension_semantics = [#tpu.dimension_semantics<arbitrary>], iteration_bounds = array<i64: 2>, scalar_prefetch = 0 : i64, scratch_operands = 1 : i64, tpu.core_type = #tpu.core_type<tc>, window_params = [{pipeline_mode = #tpu.pipeline_mode<synchronous>, transform_indices = @transform_0, window_bounds = array<i64: 8, 8, 32>}, {transform_indices = @transform_1, window_bounds = array<i64: 1, 8, 32>}, {transform_indices = @transform_2, window_bounds = array<i64: 1, 8, 32>}, {transform_indices = @transform_3, window_bounds = array<i64: 1, 32, 128>}, {transform_indices = @transform_4, window_bounds = array<i64: 1, 32, 128>}, {transform_indices = @transform_5, window_bounds = array<i64: 1, 1, 128>}, {pipeline_mode = #tpu.pipeline_mode<synchronous>, transform_indices = @transform_6, window_bounds = array<i64: 32, 128>}, {pipeline_mode = #tpu.pipeline_mode<synchronous>, transform_indices = @transform_7, window_bounds = array<i64: 1, 128>}, {pipeline_mode = #tpu.pipeline_mode<synchronous>, transform_indices = @transform_8, window_bounds = array<i64: 8, 128>}]} {
    %c0_i32 = arith.constant 0 : i32
    %0 = arith.cmpi eq, %arg0, %c0_i32 : i32
    %1 = arith.extui %0 : i1 to i32
    %c0_i32_0 = arith.constant 0 : i32
    %2 = arith.cmpi ne, %1, %c0_i32_0 : i32
    scf.if %2 {
      %c0_96 = arith.constant 0 : index
      %c0_97 = arith.constant 0 : index
      %c0_98 = arith.constant 0 : index
      %312 = vector.load %arg1[%c0_96, %c0_97, %c0_98] : memref<8x8x32xbf16, #tpu.memory_space<vmem>>, vector<8x8x32xbf16>
      %c0_99 = arith.constant 0 : index
      %c0_100 = arith.constant 0 : index
      %c0_101 = arith.constant 0 : index
      %313 = vector.load %arg10[%c0_99, %c0_100, %c0_101] : memref<8x8x32xbf16, #tpu.memory_space<vmem>>, vector<8x8x32xbf16>
      tpu.vector_store %arg10[%c0_99, %c0_100, %c0_101], %312 {strides = array<i32>} : memref<8x8x32xbf16, #tpu.memory_space<vmem>>, vector<8x8x32xbf16>,
    } else {
    }
    %c0 = arith.constant 0 : index
    %c0_1 = arith.constant 0 : index
    %c0_2 = arith.constant 0 : index
    %3 = vector.load %arg4[%c0, %c0_1, %c0_2] : memref<1x32x128xbf16, #tpu.memory_space<vmem>>, vector<1x32x128xbf16>
    %4 = vector.shape_cast %3 : vector<1x32x128xbf16> to vector<32x128xbf16>
    %c0_3 = arith.constant 0 : index
    %c0_4 = arith.constant 0 : index
    %c0_5 = arith.constant 0 : index
    %5 = vector.load %arg5[%c0_3, %c0_4, %c0_5] : memref<1x32x128xbf16, #tpu.memory_space<vmem>>, vector<1x32x128xbf16>
    %6 = vector.shape_cast %5 : vector<1x32x128xbf16> to vector<32x128xbf16>
    %c0_6 = arith.constant 0 : index
    %c0_7 = arith.constant 0 : index
    %c0_8 = arith.constant 0 : index
    %7 = vector.load %arg6[%c0_6, %c0_7, %c0_8] : memref<1x1x128xf32, #tpu.memory_space<vmem>>, vector<1x1x128xf32>
    %8 = vector.shape_cast %7 : vector<1x1x128xf32> to vector<1x128xf32>
    %c0_9 = arith.constant 0 : index
    %c0_10 = arith.constant 0 : index
    %c0_11 = arith.constant 0 : index
    %9 = vector.load %arg2[%c0_9, %c0_10, %c0_11] : memref<1x8x32xf32, #tpu.memory_space<vmem>>, vector<1x8x32xf32>
    %10 = vector.shape_cast %9 : vector<1x8x32xf32> to vector<8x32xf32>
    %c0_12 = arith.constant 0 : index
    %c0_13 = arith.constant 0 : index
    %c0_14 = arith.constant 0 : index
    %11 = vector.load %arg3[%c0_12, %c0_13, %c0_14] : memref<1x8x32xf32, #tpu.memory_space<vmem>>, vector<1x8x32xf32>
    %12 = vector.shape_cast %11 : vector<1x8x32xf32> to vector<8x32xf32>
    %c0_15 = arith.constant 0 : index
    %c0_16 = arith.constant 0 : index
    %c0_17 = arith.constant 0 : index
    %13 = vector.load %arg10[%c0_15, %c0_16, %c0_17] : memref<8x8x32xbf16, #tpu.memory_space<vmem>>, vector<1x8x32xbf16>
    %14 = vector.shape_cast %13 : vector<1x8x32xbf16> to vector<8x32xbf16>
    %cst = arith.constant dense<0.000000e+00> : vector<8x128xf32>
    %15 = tpu.matmul %14, %4, %cst {dimension_numbers = #tpu.dot_dimension_numbers<[1], [0], [0], [1], [0, 0, 1, 1], [], []>} : vector<8x32xbf16>, vector<32x128xbf16>, vector<8x128xf32> -> vector<8x128xf32>
    %16 = arith.truncf %10 : vector<8x32xf32> to vector<8x32xbf16>
    %cst_18 = arith.constant dense<0.000000e+00> : vector<8x128xf32>
    %17 = tpu.matmul %16, %6, %cst_18 {dimension_numbers = #tpu.dot_dimension_numbers<[1], [0], [0], [1], [0, 0, 1, 1], [], []>} : vector<8x32xbf16>, vector<32x128xbf16>, vector<8x128xf32> -> vector<8x128xf32>
    %18 = arith.addf %15, %17 : vector<8x128xf32>
    %19 = vector.broadcast %8 : vector<1x128xf32> to vector<8x128xf32>
    %20 = arith.addf %18, %19 : vector<8x128xf32>
    %21 = vector.extract_strided_slice %20 {offsets = [0, 0], sizes = [8, 32], strides = [1, 1]} : vector<8x128xf32> to vector<8x32xf32>
    %22 = arith.negf %21 : vector<8x32xf32>
    %23 = math.exp %22 : vector<8x32xf32>
    %cst_19 = arith.constant 1.000000e+00 : f32
    %24 = vector.broadcast %cst_19 : f32 to vector<8x32xf32>
    %25 = arith.addf %24, %23 : vector<8x32xf32>
    %26 = arith.divf %24, %25 : vector<8x32xf32>
    %27 = vector.extract_strided_slice %20 {offsets = [0, 32], sizes = [8, 32], strides = [1, 1]} : vector<8x128xf32> to vector<8x32xf32>
    %28 = arith.negf %27 : vector<8x32xf32>
    %29 = math.exp %28 : vector<8x32xf32>
    %cst_20 = arith.constant 1.000000e+00 : f32
    %30 = vector.broadcast %cst_20 : f32 to vector<8x32xf32>
    %31 = arith.addf %30, %29 : vector<8x32xf32>
    %32 = arith.divf %30, %31 : vector<8x32xf32>
    %33 = vector.extract_strided_slice %20 {offsets = [0, 64], sizes = [8, 32], strides = [1, 1]} : vector<8x128xf32> to vector<8x32xf32>
    %34 = math.tanh %33 : vector<8x32xf32>
    %35 = vector.extract_strided_slice %20 {offsets = [0, 96], sizes = [8, 32], strides = [1, 1]} : vector<8x128xf32> to vector<8x32xf32>
    %36 = arith.negf %35 : vector<8x32xf32>
    %37 = math.exp %36 : vector<8x32xf32>
    %cst_21 = arith.constant 1.000000e+00 : f32
    %38 = vector.broadcast %cst_21 : f32 to vector<8x32xf32>
    %39 = arith.addf %38, %37 : vector<8x32xf32>
    %40 = arith.divf %38, %39 : vector<8x32xf32>
    %41 = arith.mulf %32, %12 : vector<8x32xf32>
    %42 = arith.mulf %26, %34 : vector<8x32xf32>
    %43 = arith.addf %41, %42 : vector<8x32xf32>
    %44 = math.tanh %43 : vector<8x32xf32>
    %45 = arith.mulf %40, %44 : vector<8x32xf32>
    %46 = arith.truncf %45 : vector<8x32xf32> to vector<8x32xbf16>
    %c0_22 = arith.constant 0 : index
    %c0_23 = arith.constant 0 : index
    %c0_24 = arith.constant 0 : index
    %47 = vector.load %arg10[%c0_22, %c0_23, %c0_24] : memref<8x8x32xbf16, #tpu.memory_space<vmem>>, vector<1x8x32xbf16>
    %48 = vector.shape_cast %47 : vector<1x8x32xbf16> to vector<8x32xbf16>
    %49 = vector.shape_cast %46 : vector<8x32xbf16> to vector<1x8x32xbf16>
    tpu.vector_store %arg10[%c0_22, %c0_23, %c0_24], %49 {strides = array<i32>} : memref<8x8x32xbf16, #tpu.memory_space<vmem>>, vector<1x8x32xbf16>,
    %c1 = arith.constant 1 : index
    %c0_25 = arith.constant 0 : index
    %c0_26 = arith.constant 0 : index
    %50 = vector.load %arg10[%c1, %c0_25, %c0_26] : memref<8x8x32xbf16, #tpu.memory_space<vmem>>, vector<1x8x32xbf16>
    %51 = vector.shape_cast %50 : vector<1x8x32xbf16> to vector<8x32xbf16>
    %cst_27 = arith.constant dense<0.000000e+00> : vector<8x128xf32>
    %52 = tpu.matmul %51, %4, %cst_27 {dimension_numbers = #tpu.dot_dimension_numbers<[1], [0], [0], [1], [0, 0, 1, 1], [], []>} : vector<8x32xbf16>, vector<32x128xbf16>, vector<8x128xf32> -> vector<8x128xf32>
    %53 = arith.truncf %45 : vector<8x32xf32> to vector<8x32xbf16>
    %cst_28 = arith.constant dense<0.000000e+00> : vector<8x128xf32>
    %54 = tpu.matmul %53, %6, %cst_28 {dimension_numbers = #tpu.dot_dimension_numbers<[1], [0], [0], [1], [0, 0, 1, 1], [], []>} : vector<8x32xbf16>, vector<32x128xbf16>, vector<8x128xf32> -> vector<8x128xf32>
    %55 = arith.addf %52, %54 : vector<8x128xf32>
    %56 = vector.broadcast %8 : vector<1x128xf32> to vector<8x128xf32>
    %57 = arith.addf %55, %56 : vector<8x128xf32>
    %58 = vector.extract_strided_slice %57 {offsets = [0, 0], sizes = [8, 32], strides = [1, 1]} : vector<8x128xf32> to vector<8x32xf32>
    %59 = arith.negf %58 : vector<8x32xf32>
    %60 = math.exp %59 : vector<8x32xf32>
    %cst_29 = arith.constant 1.000000e+00 : f32
    %61 = vector.broadcast %cst_29 : f32 to vector<8x32xf32>
    %62 = arith.addf %61, %60 : vector<8x32xf32>
    %63 = arith.divf %61, %62 : vector<8x32xf32>
    %64 = vector.extract_strided_slice %57 {offsets = [0, 32], sizes = [8, 32], strides = [1, 1]} : vector<8x128xf32> to vector<8x32xf32>
    %65 = arith.negf %64 : vector<8x32xf32>
    %66 = math.exp %65 : vector<8x32xf32>
    %cst_30 = arith.constant 1.000000e+00 : f32
    %67 = vector.broadcast %cst_30 : f32 to vector<8x32xf32>
    %68 = arith.addf %67, %66 : vector<8x32xf32>
    %69 = arith.divf %67, %68 : vector<8x32xf32>
    %70 = vector.extract_strided_slice %57 {offsets = [0, 64], sizes = [8, 32], strides = [1, 1]} : vector<8x128xf32> to vector<8x32xf32>
    %71 = math.tanh %70 : vector<8x32xf32>
    %72 = vector.extract_strided_slice %57 {offsets = [0, 96], sizes = [8, 32], strides = [1, 1]} : vector<8x128xf32> to vector<8x32xf32>
    %73 = arith.negf %72 : vector<8x32xf32>
    %74 = math.exp %73 : vector<8x32xf32>
    %cst_31 = arith.constant 1.000000e+00 : f32
    %75 = vector.broadcast %cst_31 : f32 to vector<8x32xf32>
    %76 = arith.addf %75, %74 : vector<8x32xf32>
    %77 = arith.divf %75, %76 : vector<8x32xf32>
    %78 = arith.mulf %69, %43 : vector<8x32xf32>
    %79 = arith.mulf %63, %71 : vector<8x32xf32>
    %80 = arith.addf %78, %79 : vector<8x32xf32>
    %81 = math.tanh %80 : vector<8x32xf32>
    %82 = arith.mulf %77, %81 : vector<8x32xf32>
    %83 = arith.truncf %82 : vector<8x32xf32> to vector<8x32xbf16>
    %c1_32 = arith.constant 1 : index
    %c0_33 = arith.constant 0 : index
    %c0_34 = arith.constant 0 : index
    %84 = vector.load %arg10[%c1_32, %c0_33, %c0_34] : memref<8x8x32xbf16, #tpu.memory_space<vmem>>, vector<1x8x32xbf16>
    %85 = vector.shape_cast %84 : vector<1x8x32xbf16> to vector<8x32xbf16>
    %86 = vector.shape_cast %83 : vector<8x32xbf16> to vector<1x8x32xbf16>
    tpu.vector_store %arg10[%c1_32, %c0_33, %c0_34], %86 {strides = array<i32>} : memref<8x8x32xbf16, #tpu.memory_space<vmem>>, vector<1x8x32xbf16>,
    %c2 = arith.constant 2 : index
    %c0_35 = arith.constant 0 : index
    %c0_36 = arith.constant 0 : index
    %87 = vector.load %arg10[%c2, %c0_35, %c0_36] : memref<8x8x32xbf16, #tpu.memory_space<vmem>>, vector<1x8x32xbf16>
    %88 = vector.shape_cast %87 : vector<1x8x32xbf16> to vector<8x32xbf16>
    %cst_37 = arith.constant dense<0.000000e+00> : vector<8x128xf32>
    %89 = tpu.matmul %88, %4, %cst_37 {dimension_numbers = #tpu.dot_dimension_numbers<[1], [0], [0], [1], [0, 0, 1, 1], [], []>} : vector<8x32xbf16>, vector<32x128xbf16>, vector<8x128xf32> -> vector<8x128xf32>
    %90 = arith.truncf %82 : vector<8x32xf32> to vector<8x32xbf16>
    %cst_38 = arith.constant dense<0.000000e+00> : vector<8x128xf32>
    %91 = tpu.matmul %90, %6, %cst_38 {dimension_numbers = #tpu.dot_dimension_numbers<[1], [0], [0], [1], [0, 0, 1, 1], [], []>} : vector<8x32xbf16>, vector<32x128xbf16>, vector<8x128xf32> -> vector<8x128xf32>
    %92 = arith.addf %89, %91 : vector<8x128xf32>
    %93 = vector.broadcast %8 : vector<1x128xf32> to vector<8x128xf32>
    %94 = arith.addf %92, %93 : vector<8x128xf32>
    %95 = vector.extract_strided_slice %94 {offsets = [0, 0], sizes = [8, 32], strides = [1, 1]} : vector<8x128xf32> to vector<8x32xf32>
    %96 = arith.negf %95 : vector<8x32xf32>
    %97 = math.exp %96 : vector<8x32xf32>
    %cst_39 = arith.constant 1.000000e+00 : f32
    %98 = vector.broadcast %cst_39 : f32 to vector<8x32xf32>
    %99 = arith.addf %98, %97 : vector<8x32xf32>
    %100 = arith.divf %98, %99 : vector<8x32xf32>
    %101 = vector.extract_strided_slice %94 {offsets = [0, 32], sizes = [8, 32], strides = [1, 1]} : vector<8x128xf32> to vector<8x32xf32>
    %102 = arith.negf %101 : vector<8x32xf32>
    %103 = math.exp %102 : vector<8x32xf32>
    %cst_40 = arith.constant 1.000000e+00 : f32
    %104 = vector.broadcast %cst_40 : f32 to vector<8x32xf32>
    %105 = arith.addf %104, %103 : vector<8x32xf32>
    %106 = arith.divf %104, %105 : vector<8x32xf32>
    %107 = vector.extract_strided_slice %94 {offsets = [0, 64], sizes = [8, 32], strides = [1, 1]} : vector<8x128xf32> to vector<8x32xf32>
    %108 = math.tanh %107 : vector<8x32xf32>
    %109 = vector.extract_strided_slice %94 {offsets = [0, 96], sizes = [8, 32], strides = [1, 1]} : vector<8x128xf32> to vector<8x32xf32>
    %110 = arith.negf %109 : vector<8x32xf32>
    %111 = math.exp %110 : vector<8x32xf32>
    %cst_41 = arith.constant 1.000000e+00 : f32
    %112 = vector.broadcast %cst_41 : f32 to vector<8x32xf32>
    %113 = arith.addf %112, %111 : vector<8x32xf32>
    %114 = arith.divf %112, %113 : vector<8x32xf32>
    %115 = arith.mulf %106, %80 : vector<8x32xf32>
    %116 = arith.mulf %100, %108 : vector<8x32xf32>
    %117 = arith.addf %115, %116 : vector<8x32xf32>
    %118 = math.tanh %117 : vector<8x32xf32>
    %119 = arith.mulf %114, %118 : vector<8x32xf32>
    %120 = arith.truncf %119 : vector<8x32xf32> to vector<8x32xbf16>
    %c2_42 = arith.constant 2 : index
    %c0_43 = arith.constant 0 : index
    %c0_44 = arith.constant 0 : index
    %121 = vector.load %arg10[%c2_42, %c0_43, %c0_44] : memref<8x8x32xbf16, #tpu.memory_space<vmem>>, vector<1x8x32xbf16>
    %122 = vector.shape_cast %121 : vector<1x8x32xbf16> to vector<8x32xbf16>
    %123 = vector.shape_cast %120 : vector<8x32xbf16> to vector<1x8x32xbf16>
    tpu.vector_store %arg10[%c2_42, %c0_43, %c0_44], %123 {strides = array<i32>} : memref<8x8x32xbf16, #tpu.memory_space<vmem>>, vector<1x8x32xbf16>,
    %c3 = arith.constant 3 : index
    %c0_45 = arith.constant 0 : index
    %c0_46 = arith.constant 0 : index
    %124 = vector.load %arg10[%c3, %c0_45, %c0_46] : memref<8x8x32xbf16, #tpu.memory_space<vmem>>, vector<1x8x32xbf16>
    %125 = vector.shape_cast %124 : vector<1x8x32xbf16> to vector<8x32xbf16>
    %cst_47 = arith.constant dense<0.000000e+00> : vector<8x128xf32>
    %126 = tpu.matmul %125, %4, %cst_47 {dimension_numbers = #tpu.dot_dimension_numbers<[1], [0], [0], [1], [0, 0, 1, 1], [], []>} : vector<8x32xbf16>, vector<32x128xbf16>, vector<8x128xf32> -> vector<8x128xf32>
    %127 = arith.truncf %119 : vector<8x32xf32> to vector<8x32xbf16>
    %cst_48 = arith.constant dense<0.000000e+00> : vector<8x128xf32>
    %128 = tpu.matmul %127, %6, %cst_48 {dimension_numbers = #tpu.dot_dimension_numbers<[1], [0], [0], [1], [0, 0, 1, 1], [], []>} : vector<8x32xbf16>, vector<32x128xbf16>, vector<8x128xf32> -> vector<8x128xf32>
    %129 = arith.addf %126, %128 : vector<8x128xf32>
    %130 = vector.broadcast %8 : vector<1x128xf32> to vector<8x128xf32>
    %131 = arith.addf %129, %130 : vector<8x128xf32>
    %132 = vector.extract_strided_slice %131 {offsets = [0, 0], sizes = [8, 32], strides = [1, 1]} : vector<8x128xf32> to vector<8x32xf32>
    %133 = arith.negf %132 : vector<8x32xf32>
    %134 = math.exp %133 : vector<8x32xf32>
    %cst_49 = arith.constant 1.000000e+00 : f32
    %135 = vector.broadcast %cst_49 : f32 to vector<8x32xf32>
    %136 = arith.addf %135, %134 : vector<8x32xf32>
    %137 = arith.divf %135, %136 : vector<8x32xf32>
    %138 = vector.extract_strided_slice %131 {offsets = [0, 32], sizes = [8, 32], strides = [1, 1]} : vector<8x128xf32> to vector<8x32xf32>
    %139 = arith.negf %138 : vector<8x32xf32>
    %140 = math.exp %139 : vector<8x32xf32>
    %cst_50 = arith.constant 1.000000e+00 : f32
    %141 = vector.broadcast %cst_50 : f32 to vector<8x32xf32>
    %142 = arith.addf %141, %140 : vector<8x32xf32>
    %143 = arith.divf %141, %142 : vector<8x32xf32>
    %144 = vector.extract_strided_slice %131 {offsets = [0, 64], sizes = [8, 32], strides = [1, 1]} : vector<8x128xf32> to vector<8x32xf32>
    %145 = math.tanh %144 : vector<8x32xf32>
    %146 = vector.extract_strided_slice %131 {offsets = [0, 96], sizes = [8, 32], strides = [1, 1]} : vector<8x128xf32> to vector<8x32xf32>
    %147 = arith.negf %146 : vector<8x32xf32>
    %148 = math.exp %147 : vector<8x32xf32>
    %cst_51 = arith.constant 1.000000e+00 : f32
    %149 = vector.broadcast %cst_51 : f32 to vector<8x32xf32>
    %150 = arith.addf %149, %148 : vector<8x32xf32>
    %151 = arith.divf %149, %150 : vector<8x32xf32>
    %152 = arith.mulf %143, %117 : vector<8x32xf32>
    %153 = arith.mulf %137, %145 : vector<8x32xf32>
    %154 = arith.addf %152, %153 : vector<8x32xf32>
    %155 = math.tanh %154 : vector<8x32xf32>
    %156 = arith.mulf %151, %155 : vector<8x32xf32>
    %157 = arith.truncf %156 : vector<8x32xf32> to vector<8x32xbf16>
    %c3_52 = arith.constant 3 : index
    %c0_53 = arith.constant 0 : index
    %c0_54 = arith.constant 0 : index
    %158 = vector.load %arg10[%c3_52, %c0_53, %c0_54] : memref<8x8x32xbf16, #tpu.memory_space<vmem>>, vector<1x8x32xbf16>
    %159 = vector.shape_cast %158 : vector<1x8x32xbf16> to vector<8x32xbf16>
    %160 = vector.shape_cast %157 : vector<8x32xbf16> to vector<1x8x32xbf16>
    tpu.vector_store %arg10[%c3_52, %c0_53, %c0_54], %160 {strides = array<i32>} : memref<8x8x32xbf16, #tpu.memory_space<vmem>>, vector<1x8x32xbf16>,
    %c4 = arith.constant 4 : index
    %c0_55 = arith.constant 0 : index
    %c0_56 = arith.constant 0 : index
    %161 = vector.load %arg10[%c4, %c0_55, %c0_56] : memref<8x8x32xbf16, #tpu.memory_space<vmem>>, vector<1x8x32xbf16>
    %162 = vector.shape_cast %161 : vector<1x8x32xbf16> to vector<8x32xbf16>
    %cst_57 = arith.constant dense<0.000000e+00> : vector<8x128xf32>
    %163 = tpu.matmul %162, %4, %cst_57 {dimension_numbers = #tpu.dot_dimension_numbers<[1], [0], [0], [1], [0, 0, 1, 1], [], []>} : vector<8x32xbf16>, vector<32x128xbf16>, vector<8x128xf32> -> vector<8x128xf32>
    %164 = arith.truncf %156 : vector<8x32xf32> to vector<8x32xbf16>
    %cst_58 = arith.constant dense<0.000000e+00> : vector<8x128xf32>
    %165 = tpu.matmul %164, %6, %cst_58 {dimension_numbers = #tpu.dot_dimension_numbers<[1], [0], [0], [1], [0, 0, 1, 1], [], []>} : vector<8x32xbf16>, vector<32x128xbf16>, vector<8x128xf32> -> vector<8x128xf32>
    %166 = arith.addf %163, %165 : vector<8x128xf32>
    %167 = vector.broadcast %8 : vector<1x128xf32> to vector<8x128xf32>
    %168 = arith.addf %166, %167 : vector<8x128xf32>
    %169 = vector.extract_strided_slice %168 {offsets = [0, 0], sizes = [8, 32], strides = [1, 1]} : vector<8x128xf32> to vector<8x32xf32>
    %170 = arith.negf %169 : vector<8x32xf32>
    %171 = math.exp %170 : vector<8x32xf32>
    %cst_59 = arith.constant 1.000000e+00 : f32
    %172 = vector.broadcast %cst_59 : f32 to vector<8x32xf32>
    %173 = arith.addf %172, %171 : vector<8x32xf32>
    %174 = arith.divf %172, %173 : vector<8x32xf32>
    %175 = vector.extract_strided_slice %168 {offsets = [0, 32], sizes = [8, 32], strides = [1, 1]} : vector<8x128xf32> to vector<8x32xf32>
    %176 = arith.negf %175 : vector<8x32xf32>
    %177 = math.exp %176 : vector<8x32xf32>
    %cst_60 = arith.constant 1.000000e+00 : f32
    %178 = vector.broadcast %cst_60 : f32 to vector<8x32xf32>
    %179 = arith.addf %178, %177 : vector<8x32xf32>
    %180 = arith.divf %178, %179 : vector<8x32xf32>
    %181 = vector.extract_strided_slice %168 {offsets = [0, 64], sizes = [8, 32], strides = [1, 1]} : vector<8x128xf32> to vector<8x32xf32>
    %182 = math.tanh %181 : vector<8x32xf32>
    %183 = vector.extract_strided_slice %168 {offsets = [0, 96], sizes = [8, 32], strides = [1, 1]} : vector<8x128xf32> to vector<8x32xf32>
    %184 = arith.negf %183 : vector<8x32xf32>
    %185 = math.exp %184 : vector<8x32xf32>
    %cst_61 = arith.constant 1.000000e+00 : f32
    %186 = vector.broadcast %cst_61 : f32 to vector<8x32xf32>
    %187 = arith.addf %186, %185 : vector<8x32xf32>
    %188 = arith.divf %186, %187 : vector<8x32xf32>
    %189 = arith.mulf %180, %154 : vector<8x32xf32>
    %190 = arith.mulf %174, %182 : vector<8x32xf32>
    %191 = arith.addf %189, %190 : vector<8x32xf32>
    %192 = math.tanh %191 : vector<8x32xf32>
    %193 = arith.mulf %188, %192 : vector<8x32xf32>
    %194 = arith.truncf %193 : vector<8x32xf32> to vector<8x32xbf16>
    %c4_62 = arith.constant 4 : index
    %c0_63 = arith.constant 0 : index
    %c0_64 = arith.constant 0 : index
    %195 = vector.load %arg10[%c4_62, %c0_63, %c0_64] : memref<8x8x32xbf16, #tpu.memory_space<vmem>>, vector<1x8x32xbf16>
    %196 = vector.shape_cast %195 : vector<1x8x32xbf16> to vector<8x32xbf16>
    %197 = vector.shape_cast %194 : vector<8x32xbf16> to vector<1x8x32xbf16>
    tpu.vector_store %arg10[%c4_62, %c0_63, %c0_64], %197 {strides = array<i32>} : memref<8x8x32xbf16, #tpu.memory_space<vmem>>, vector<1x8x32xbf16>,
    %c5 = arith.constant 5 : index
    %c0_65 = arith.constant 0 : index
    %c0_66 = arith.constant 0 : index
    %198 = vector.load %arg10[%c5, %c0_65, %c0_66] : memref<8x8x32xbf16, #tpu.memory_space<vmem>>, vector<1x8x32xbf16>
    %199 = vector.shape_cast %198 : vector<1x8x32xbf16> to vector<8x32xbf16>
    %cst_67 = arith.constant dense<0.000000e+00> : vector<8x128xf32>
    %200 = tpu.matmul %199, %4, %cst_67 {dimension_numbers = #tpu.dot_dimension_numbers<[1], [0], [0], [1], [0, 0, 1, 1], [], []>} : vector<8x32xbf16>, vector<32x128xbf16>, vector<8x128xf32> -> vector<8x128xf32>
    %201 = arith.truncf %193 : vector<8x32xf32> to vector<8x32xbf16>
    %cst_68 = arith.constant dense<0.000000e+00> : vector<8x128xf32>
    %202 = tpu.matmul %201, %6, %cst_68 {dimension_numbers = #tpu.dot_dimension_numbers<[1], [0], [0], [1], [0, 0, 1, 1], [], []>} : vector<8x32xbf16>, vector<32x128xbf16>, vector<8x128xf32> -> vector<8x128xf32>
    %203 = arith.addf %200, %202 : vector<8x128xf32>
    %204 = vector.broadcast %8 : vector<1x128xf32> to vector<8x128xf32>
    %205 = arith.addf %203, %204 : vector<8x128xf32>
    %206 = vector.extract_strided_slice %205 {offsets = [0, 0], sizes = [8, 32], strides = [1, 1]} : vector<8x128xf32> to vector<8x32xf32>
    %207 = arith.negf %206 : vector<8x32xf32>
    %208 = math.exp %207 : vector<8x32xf32>
    %cst_69 = arith.constant 1.000000e+00 : f32
    %209 = vector.broadcast %cst_69 : f32 to vector<8x32xf32>
    %210 = arith.addf %209, %208 : vector<8x32xf32>
    %211 = arith.divf %209, %210 : vector<8x32xf32>
    %212 = vector.extract_strided_slice %205 {offsets = [0, 32], sizes = [8, 32], strides = [1, 1]} : vector<8x128xf32> to vector<8x32xf32>
    %213 = arith.negf %212 : vector<8x32xf32>
    %214 = math.exp %213 : vector<8x32xf32>
    %cst_70 = arith.constant 1.000000e+00 : f32
    %215 = vector.broadcast %cst_70 : f32 to vector<8x32xf32>
    %216 = arith.addf %215, %214 : vector<8x32xf32>
    %217 = arith.divf %215, %216 : vector<8x32xf32>
    %218 = vector.extract_strided_slice %205 {offsets = [0, 64], sizes = [8, 32], strides = [1, 1]} : vector<8x128xf32> to vector<8x32xf32>
    %219 = math.tanh %218 : vector<8x32xf32>
    %220 = vector.extract_strided_slice %205 {offsets = [0, 96], sizes = [8, 32], strides = [1, 1]} : vector<8x128xf32> to vector<8x32xf32>
    %221 = arith.negf %220 : vector<8x32xf32>
    %222 = math.exp %221 : vector<8x32xf32>
    %cst_71 = arith.constant 1.000000e+00 : f32
    %223 = vector.broadcast %cst_71 : f32 to vector<8x32xf32>
    %224 = arith.addf %223, %222 : vector<8x32xf32>
    %225 = arith.divf %223, %224 : vector<8x32xf32>
    %226 = arith.mulf %217, %191 : vector<8x32xf32>
    %227 = arith.mulf %211, %219 : vector<8x32xf32>
    %228 = arith.addf %226, %227 : vector<8x32xf32>
    %229 = math.tanh %228 : vector<8x32xf32>
    %230 = arith.mulf %225, %229 : vector<8x32xf32>
    %231 = arith.truncf %230 : vector<8x32xf32> to vector<8x32xbf16>
    %c5_72 = arith.constant 5 : index
    %c0_73 = arith.constant 0 : index
    %c0_74 = arith.constant 0 : index
    %232 = vector.load %arg10[%c5_72, %c0_73, %c0_74] : memref<8x8x32xbf16, #tpu.memory_space<vmem>>, vector<1x8x32xbf16>
    %233 = vector.shape_cast %232 : vector<1x8x32xbf16> to vector<8x32xbf16>
    %234 = vector.shape_cast %231 : vector<8x32xbf16> to vector<1x8x32xbf16>
    tpu.vector_store %arg10[%c5_72, %c0_73, %c0_74], %234 {strides = array<i32>} : memref<8x8x32xbf16, #tpu.memory_space<vmem>>, vector<1x8x32xbf16>,
    %c6 = arith.constant 6 : index
    %c0_75 = arith.constant 0 : index
    %c0_76 = arith.constant 0 : index
    %235 = vector.load %arg10[%c6, %c0_75, %c0_76] : memref<8x8x32xbf16, #tpu.memory_space<vmem>>, vector<1x8x32xbf16>
    %236 = vector.shape_cast %235 : vector<1x8x32xbf16> to vector<8x32xbf16>
    %cst_77 = arith.constant dense<0.000000e+00> : vector<8x128xf32>
    %237 = tpu.matmul %236, %4, %cst_77 {dimension_numbers = #tpu.dot_dimension_numbers<[1], [0], [0], [1], [0, 0, 1, 1], [], []>} : vector<8x32xbf16>, vector<32x128xbf16>, vector<8x128xf32> -> vector<8x128xf32>
    %238 = arith.truncf %230 : vector<8x32xf32> to vector<8x32xbf16>
    %cst_78 = arith.constant dense<0.000000e+00> : vector<8x128xf32>
    %239 = tpu.matmul %238, %6, %cst_78 {dimension_numbers = #tpu.dot_dimension_numbers<[1], [0], [0], [1], [0, 0, 1, 1], [], []>} : vector<8x32xbf16>, vector<32x128xbf16>, vector<8x128xf32> -> vector<8x128xf32>
    %240 = arith.addf %237, %239 : vector<8x128xf32>
    %241 = vector.broadcast %8 : vector<1x128xf32> to vector<8x128xf32>
    %242 = arith.addf %240, %241 : vector<8x128xf32>
    %243 = vector.extract_strided_slice %242 {offsets = [0, 0], sizes = [8, 32], strides = [1, 1]} : vector<8x128xf32> to vector<8x32xf32>
    %244 = arith.negf %243 : vector<8x32xf32>
    %245 = math.exp %244 : vector<8x32xf32>
    %cst_79 = arith.constant 1.000000e+00 : f32
    %246 = vector.broadcast %cst_79 : f32 to vector<8x32xf32>
    %247 = arith.addf %246, %245 : vector<8x32xf32>
    %248 = arith.divf %246, %247 : vector<8x32xf32>
    %249 = vector.extract_strided_slice %242 {offsets = [0, 32], sizes = [8, 32], strides = [1, 1]} : vector<8x128xf32> to vector<8x32xf32>
    %250 = arith.negf %249 : vector<8x32xf32>
    %251 = math.exp %250 : vector<8x32xf32>
    %cst_80 = arith.constant 1.000000e+00 : f32
    %252 = vector.broadcast %cst_80 : f32 to vector<8x32xf32>
    %253 = arith.addf %252, %251 : vector<8x32xf32>
    %254 = arith.divf %252, %253 : vector<8x32xf32>
    %255 = vector.extract_strided_slice %242 {offsets = [0, 64], sizes = [8, 32], strides = [1, 1]} : vector<8x128xf32> to vector<8x32xf32>
    %256 = math.tanh %255 : vector<8x32xf32>
    %257 = vector.extract_strided_slice %242 {offsets = [0, 96], sizes = [8, 32], strides = [1, 1]} : vector<8x128xf32> to vector<8x32xf32>
    %258 = arith.negf %257 : vector<8x32xf32>
    %259 = math.exp %258 : vector<8x32xf32>
    %cst_81 = arith.constant 1.000000e+00 : f32
    %260 = vector.broadcast %cst_81 : f32 to vector<8x32xf32>
    %261 = arith.addf %260, %259 : vector<8x32xf32>
    %262 = arith.divf %260, %261 : vector<8x32xf32>
    %263 = arith.mulf %254, %228 : vector<8x32xf32>
    %264 = arith.mulf %248, %256 : vector<8x32xf32>
    %265 = arith.addf %263, %264 : vector<8x32xf32>
    %266 = math.tanh %265 : vector<8x32xf32>
    %267 = arith.mulf %262, %266 : vector<8x32xf32>
    %268 = arith.truncf %267 : vector<8x32xf32> to vector<8x32xbf16>
    %c6_82 = arith.constant 6 : index
    %c0_83 = arith.constant 0 : index
    %c0_84 = arith.constant 0 : index
    %269 = vector.load %arg10[%c6_82, %c0_83, %c0_84] : memref<8x8x32xbf16, #tpu.memory_space<vmem>>, vector<1x8x32xbf16>
    %270 = vector.shape_cast %269 : vector<1x8x32xbf16> to vector<8x32xbf16>
    %271 = vector.shape_cast %268 : vector<8x32xbf16> to vector<1x8x32xbf16>
    tpu.vector_store %arg10[%c6_82, %c0_83, %c0_84], %271 {strides = array<i32>} : memref<8x8x32xbf16, #tpu.memory_space<vmem>>, vector<1x8x32xbf16>,
    %c7 = arith.constant 7 : index
    %c0_85 = arith.constant 0 : index
    %c0_86 = arith.constant 0 : index
    %272 = vector.load %arg10[%c7, %c0_85, %c0_86] : memref<8x8x32xbf16, #tpu.memory_space<vmem>>, vector<1x8x32xbf16>
    %273 = vector.shape_cast %272 : vector<1x8x32xbf16> to vector<8x32xbf16>
    %cst_87 = arith.constant dense<0.000000e+00> : vector<8x128xf32>
    %274 = tpu.matmul %273, %4, %cst_87 {dimension_numbers = #tpu.dot_dimension_numbers<[1], [0], [0], [1], [0, 0, 1, 1], [], []>} : vector<8x32xbf16>, vector<32x128xbf16>, vector<8x128xf32> -> vector<8x128xf32>
    %275 = arith.truncf %267 : vector<8x32xf32> to vector<8x32xbf16>
    %cst_88 = arith.constant dense<0.000000e+00> : vector<8x128xf32>
    %276 = tpu.matmul %275, %6, %cst_88 {dimension_numbers = #tpu.dot_dimension_numbers<[1], [0], [0], [1], [0, 0, 1, 1], [], []>} : vector<8x32xbf16>, vector<32x128xbf16>, vector<8x128xf32> -> vector<8x128xf32>
    %277 = arith.addf %274, %276 : vector<8x128xf32>
    %278 = vector.broadcast %8 : vector<1x128xf32> to vector<8x128xf32>
    %279 = arith.addf %277, %278 : vector<8x128xf32>
    %280 = vector.extract_strided_slice %279 {offsets = [0, 0], sizes = [8, 32], strides = [1, 1]} : vector<8x128xf32> to vector<8x32xf32>
    %281 = arith.negf %280 : vector<8x32xf32>
    %282 = math.exp %281 : vector<8x32xf32>
    %cst_89 = arith.constant 1.000000e+00 : f32
    %283 = vector.broadcast %cst_89 : f32 to vector<8x32xf32>
    %284 = arith.addf %283, %282 : vector<8x32xf32>
    %285 = arith.divf %283, %284 : vector<8x32xf32>
    %286 = vector.extract_strided_slice %279 {offsets = [0, 32], sizes = [8, 32], strides = [1, 1]} : vector<8x128xf32> to vector<8x32xf32>
    %287 = arith.negf %286 : vector<8x32xf32>
    %288 = math.exp %287 : vector<8x32xf32>
    %cst_90 = arith.constant 1.000000e+00 : f32
    %289 = vector.broadcast %cst_90 : f32 to vector<8x32xf32>
    %290 = arith.addf %289, %288 : vector<8x32xf32>
    %291 = arith.divf %289, %290 : vector<8x32xf32>
    %292 = vector.extract_strided_slice %279 {offsets = [0, 64], sizes = [8, 32], strides = [1, 1]} : vector<8x128xf32> to vector<8x32xf32>
    %293 = math.tanh %292 : vector<8x32xf32>
    %294 = vector.extract_strided_slice %279 {offsets = [0, 96], sizes = [8, 32], strides = [1, 1]} : vector<8x128xf32> to vector<8x32xf32>
    %295 = arith.negf %294 : vector<8x32xf32>
    %296 = math.exp %295 : vector<8x32xf32>
    %cst_91 = arith.constant 1.000000e+00 : f32
    %297 = vector.broadcast %cst_91 : f32 to vector<8x32xf32>
    %298 = arith.addf %297, %296 : vector<8x32xf32>
    %299 = arith.divf %297, %298 : vector<8x32xf32>
    %300 = arith.mulf %291, %265 : vector<8x32xf32>
    %301 = arith.mulf %285, %293 : vector<8x32xf32>
    %302 = arith.addf %300, %301 : vector<8x32xf32>
    %303 = math.tanh %302 : vector<8x32xf32>
    %304 = arith.mulf %299, %303 : vector<8x32xf32>
    %305 = arith.truncf %304 : vector<8x32xf32> to vector<8x32xbf16>
    %c7_92 = arith.constant 7 : index
    %c0_93 = arith.constant 0 : index
    %c0_94 = arith.constant 0 : index
    %306 = vector.load %arg10[%c7_92, %c0_93, %c0_94] : memref<8x8x32xbf16, #tpu.memory_space<vmem>>, vector<1x8x32xbf16>
    %307 = vector.shape_cast %306 : vector<1x8x32xbf16> to vector<8x32xbf16>
    %308 = vector.shape_cast %305 : vector<8x32xbf16> to vector<1x8x32xbf16>
    tpu.vector_store %arg10[%c7_92, %c0_93, %c0_94], %308 {strides = array<i32>} : memref<8x8x32xbf16, #tpu.memory_space<vmem>>, vector<1x8x32xbf16>,
    %c1_i32 = arith.constant 1 : i32
    %309 = arith.cmpi eq, %arg0, %c1_i32 : i32
    %310 = arith.extui %309 : i1 to i32
    %c0_i32_95 = arith.constant 0 : i32
    %311 = arith.cmpi ne, %310, %c0_i32_95 : i32
    scf.if %311 {
      %312 = arith.truncf %304 : vector<8x32xf32> to vector<8x32xbf16>
      %c0_96 = arith.constant 0 : index
      %c0_97 = arith.constant 0 : index
      %313 = vector.load %arg7[%c0_96, %c0_97] : memref<32x128xbf16, #tpu.memory_space<vmem>>, vector<32x128xbf16>
      %cst_98 = arith.constant dense<0.000000e+00> : vector<8x128xf32>
      %314 = tpu.matmul %312, %313, %cst_98 {dimension_numbers = #tpu.dot_dimension_numbers<[1], [0], [0], [1], [0, 0, 1, 1], [], []>} : vector<8x32xbf16>, vector<32x128xbf16>, vector<8x128xf32> -> vector<8x128xf32>
      %c0_99 = arith.constant 0 : index
      %c0_100 = arith.constant 0 : index
      %315 = vector.load %arg8[%c0_99, %c0_100] : memref<1x128xf32, #tpu.memory_space<vmem>>, vector<1x128xf32>
      %316 = vector.broadcast %315 : vector<1x128xf32> to vector<8x128xf32>
      %317 = arith.addf %314, %316 : vector<8x128xf32>
      %c0_101 = arith.constant 0 : index
      %c0_102 = arith.constant 0 : index
      %318 = vector.load %arg9[%c0_101, %c0_102] : memref<8x128xf32, #tpu.memory_space<vmem>>, vector<8x128xf32>
      tpu.vector_store %arg9[%c0_101, %c0_102], %317 {strides = array<i32>} : memref<8x128xf32, #tpu.memory_space<vmem>>, vector<8x128xf32>,
    } else {
    }
    return
  }
  func.func @transform_0(%arg0: i32) -> (i32, i32, i32) {
    %c0_i32 = arith.constant 0 : i32
    %c0_i32_0 = arith.constant 0 : i32
    %c0_i32_1 = arith.constant 0 : i32
    %c0_i32_2 = arith.constant 0 : i32
    return %c0_i32, %c0_i32_0, %c0_i32_1 : i32, i32, i32
  }
  func.func @transform_1(%arg0: i32) -> (i32, i32, i32) {
    %c0_i32 = arith.constant 0 : i32
    %c0_i32_0 = arith.constant 0 : i32
    %c0_i32_1 = arith.constant 0 : i32
    return %arg0, %c0_i32, %c0_i32_0 : i32, i32, i32
  }
  func.func @transform_2(%arg0: i32) -> (i32, i32, i32) {
    %c0_i32 = arith.constant 0 : i32
    %c0_i32_0 = arith.constant 0 : i32
    %c0_i32_1 = arith.constant 0 : i32
    return %arg0, %c0_i32, %c0_i32_0 : i32, i32, i32
  }
  func.func @transform_3(%arg0: i32) -> (i32, i32, i32) {
    %c0_i32 = arith.constant 0 : i32
    %c0_i32_0 = arith.constant 0 : i32
    %c0_i32_1 = arith.constant 0 : i32
    return %arg0, %c0_i32, %c0_i32_0 : i32, i32, i32
  }
  func.func @transform_4(%arg0: i32) -> (i32, i32, i32) {
    %c0_i32 = arith.constant 0 : i32
    %c0_i32_0 = arith.constant 0 : i32
    %c0_i32_1 = arith.constant 0 : i32
    return %arg0, %c0_i32, %c0_i32_0 : i32, i32, i32
  }
  func.func @transform_5(%arg0: i32) -> (i32, i32, i32) {
    %c0_i32 = arith.constant 0 : i32
    %c0_i32_0 = arith.constant 0 : i32
    %c0_i32_1 = arith.constant 0 : i32
    return %arg0, %c0_i32, %c0_i32_0 : i32, i32, i32
  }
  func.func @transform_6(%arg0: i32) -> (i32, i32) {
    %c0_i32 = arith.constant 0 : i32
    %c0_i32_0 = arith.constant 0 : i32
    %c0_i32_1 = arith.constant 0 : i32
    return %c0_i32, %c0_i32_0 : i32, i32
  }
  func.func @transform_7(%arg0: i32) -> (i32, i32) {
    %c0_i32 = arith.constant 0 : i32
    %c0_i32_0 = arith.constant 0 : i32
    %c0_i32_1 = arith.constant 0 : i32
    return %c0_i32, %c0_i32_0 : i32, i32
  }
  func.func @transform_8(%arg0: i32) -> (i32, i32) {
    %c0_i32 = arith.constant 0 : i32
    %c0_i32_0 = arith.constant 0 : i32
    %c0_i32_1 = arith.constant 0 : i32
    return %c0_i32, %c0_i32_0 : i32, i32
  }
}

</mosaic_0001>

<bundles_post_ra>
// kernel: text_classification_forward.1
= control target key start
LH: loop header
LB: loop body
LE: loop exit
PB: predicated region body
PF: predicated region fallthrough
CT: control target
= control target key end

     0   :  { %s1953_s27 = smov 0   ;;  %s2244_s0 = inlined_call_operand.vmem [shape: bf16[8,8,32], index: 0, kind: input, shape index: {}]   ;;  %s2245_s1 = inlined_call_operand.vmem [shape: f32[2,8,32], index: 1, kind: input, shape index: {}]   ;;  %s2246_s2 = inlined_call_operand.vmem [shape: f32[2,8,32], index: 2, kind: input, shape index: {}]   ;;  %s2247_s3 = inlined_call_operand.vmem [shape: bf16[2,32,128], index: 3, kind: input, shape index: {}]   ;;  %s2248_s4 = inlined_call_operand.vmem [shape: bf16[2,32,128], index: 4, kind: input, shape index: {}]   ;;  %s2249_s5 = inlined_call_operand.vmem [shape: f32[2,1,128], index: 5, kind: input, shape index: {}]   ;;  %s2250_s6 = inlined_call_operand.vmem [shape: bf16[32,128], index: 6, kind: input, shape index: {}]   ;;  %s2251_s7 = inlined_call_operand.vmem [shape: f32[1,128], index: 7, kind: input, shape index: {}]   ;;  %s2252_s8 = inlined_call_operand.vmem [shape: f32[8,128], index: 8, kind: output, shape index: {}]  }
   0x1 LB: > { %s1959_s28 = sadd.s32 4294967295, %s1899_s27   ;;  %p1559_p0 = scmp.ge.s32.totalorder %s1899_s27, 1  ;;  %s1899_s27 = sphi %s1953_s27, %s18_s27  }
   0x2   : > { %p293_p1 = scmp.lt.s32.totalorder %s1899_s27, 3 }
   0x4   : > { %p294_p2 = pnand %p1559_p0, %p293_p1 }
   0x5   : > { %p338_p3 = scmp.lt.s32.totalorder (!%p294_p2), %s1959_s28, 1  ;;  %p1566_p4 = scmp.ne.s32.totalorder (!%p294_p2), %s1959_s28, 0 }
   0x6   : > { %297 = sbr.rel (%p294_p2) target bundleno = 5894 (0x1706), region = 52 }
   0xd   : > { %s1965_s29 = scalar_select %p338_p3, %s1959_s28, 1 }
   0xe   : > { %363 = sbr.rel (%p1566_p4) target bundleno = 21 (0x15), region = 56  ;;  %v364_v0 = vld [vmem:[%s2244_s0] sm:$0xf] (!%p1566_p4)  ;;  %vm372_vm0 = vcmask (!%p1566_p4), 257024   ;;  %v365_v1 = vld [vmem:[%s2244_s0 + $0x4] sm:$0xf] (!%p1566_p4) }
   0xf   : > { %s1560_s30 = sshll.u32 %s1965_s29, 3  ;;  %s1611_s9 = sshll.u32 %s1965_s29, 4  ;;  %373 = vst.msk [vmem:[#allocation2] sm:$0xf] (!%p1566_p4), %vm372_vm0, %v364_v0  ;;  %374 = vst.msk [vmem:[#allocation2 + $0x4] sm:$0xf] (!%p1566_p4), %vm372_vm0, %v365_v1 }
  0x10   : > { %s1972_s12 = scalar_lea.vmem %s2245_s1, %s1560_s30  ;;  %s1977_s15 = scalar_lea.vmem %s2246_s2, %s1560_s30  ;;  %v366_v2 = vld [vmem:[%s2244_s0 + $0x8] sm:$0xf] (!%p1566_p4)  ;;  %v367_v3 = vld [vmem:[%s2244_s0 + $0xc] sm:$0xf] (!%p1566_p4)  ;;  %v368_v4 = vld [vmem:[%s2244_s0 + $0x10] sm:$0xf] (!%p1566_p4) }
  0x11   : > { %s1982_s18 = scalar_lea.vmem %s2247_s3, %s1611_s9  ;;  %s355_s21 = scalar_lea.vmem %s2248_s4, %s1611_s9  ;;  %375 = vst.msk [vmem:[#allocation2 + $0x8] sm:$0xf] (!%p1566_p4), %vm372_vm0, %v366_v2  ;;  %376 = vst.msk [vmem:[#allocation2 + $0xc] sm:$0xf] (!%p1566_p4), %vm372_vm0, %v367_v3  ;;  %v369_v5 = vld [vmem:[%s2244_s0 + $0x14] sm:$0xf] (!%p1566_p4) }
  0x12   : > { %s358_s24 = scalar_lea.vmem %s2249_s5, %s1965_s29  ;;  %377 = vst.msk [vmem:[#allocation2 + $0x10] sm:$0xf] (!%p1566_p4), %vm372_vm0, %v368_v4  ;;  %v370_v6 = vld [vmem:[%s2244_s0 + $0x18] sm:$0xf] (!%p1566_p4)  ;;  %v371_v7 = vld [vmem:[%s2244_s0 + $0x1c] sm:$0xf] (!%p1566_p4) }
  0x13   : > { %378 = vst.msk [vmem:[#allocation2 + $0x14] sm:$0xf] (!%p1566_p4), %vm372_vm0, %v369_v5  ;;  %379 = vst.msk [vmem:[#allocation2 + $0x18] sm:$0xf] (!%p1566_p4), %vm372_vm0, %v370_v6 }
  0x14   : > { %380 = vst.msk [vmem:[#allocation2 + $0x1c] sm:$0xf] (!%p1566_p4), %vm372_vm0, %v371_v7 }
  0x15 PF: > { %v2016_v8 = vld [vmem:[%s355_s21] sm:$0xff]   ;;  %v1901_v9 = vmov 0.0   ;;  %v2024_v11 = vld [vmem:[%s355_s21 + $0x8] sm:$0xff]   ;;  %vm1902_vm1 = vmmov 0   ;;  %vm406_vm2 = vcmask 261120   ;;  %s1903_s21 = smov 64  }
  0x16   : > { %1672 = vmatprep.subr.bf16.mxu0 %v1901_v9  ;;  %1680 = vmatprep.subr.bf16.mxu1 %v1901_v9  ;;  %v2021_v10 = vld [vmem:[%s1982_s18] sm:$0xff]   ;;  %v2031_v12 = vld [vmem:[%s1982_s18 + $0x8] sm:$0xff]   ;;  %s1904_s30 = smov 32   ;;  %vm547_vm3 = vcmask 257024   ;;  %p1604_p5 = scmp.ne.s32.totalorder %s1959_s28, 1 }
  0x17   : > { %1673 = vmatpush3.bf16.msra.mxu0 %v2016_v8  ;;  %1676 = vmatprep.mubr.msk.bf16.mxu0 %vm1902_vm1, %v1901_v9  ;;  %v390_v13 = vld [vmem:[%s1972_s12] sm:$0xff]  ;;  %s1905_s29 = smov (!%p1604_p5), 32   ;;  %vm1907_vm4 = vmmov (!%p1604_p5), 0  }
  0x18   : > { %1681 = vmatpush3.bf16.msra.mxu1 %v2021_v10  ;;  %1674 = vmatprep.subr.bf16.mxu0 %v1901_v9  ;;  %v393_v14 = vpack.c.bf16 %v390_v13, %v390_v13  ;;  %v392_v15 = vld [vmem:[#allocation2] sm:$0xf]  ;;  %v550_v39 = vld [vmem:[#allocation2 + $0x4] sm:$0xf]  ;;  %v673_v1 = vld [vmem:[#allocation2 + $0x8] sm:$0xf] }
  0x19   : > { %1682 = vmatprep.subr.bf16.mxu1 %v1901_v9  ;;  %1684 = vmatprep.mubr.msk.bf16.mxu1 %vm1902_vm1, %v1901_v9  ;;  %v2060_v17 = vld [vmem:[%s358_s24] ss:$0 sm:$0xff] }
  0x1a   : > { %v391_v28 = vld [vmem:[%s1977_s15] sm:$0xff] }
  0x1b   : > { %1675 = vmatpush3.bf16.msra.mxu0 %v2024_v11 }
  0x1c   : > { %1683 = vmatpush3.bf16.msra.mxu1 %v2031_v12  ;;  %1688 = vmatprep.subr.bf16.mxu0 %v1901_v9 }
  0x1d   : > { %1696 = vmatprep.subr.bf16.mxu1 %v1901_v9 }
  0x1e   : > { %1677 = vmatmul.mubr.msk.bf16.vlgmr.msra.gmra.mrb[0].mxu0 %vm406_vm2, %v393_v14 }
  0x1f   : > { %1685 = vmatmul.mubr.msk.bf16.vlgmr.msra.gmra.mrb[0].mxu1 %vm406_vm2, %v392_v15  ;;  %1689 = vmatpush3.bf16.msra.mxu0 %v2016_v8 }
  0x20   : > { %1697 = vmatpush3.bf16.msra.mxu1 %v2021_v10  ;;  %1690 = vmatprep.subr.bf16.mxu0 %v1901_v9 }
  0x21   : > { %1698 = vmatprep.subr.bf16.mxu1 %v1901_v9  ;;  %1700 = vmatprep.mubr.msk.bf16.mxu1 %vm1902_vm1, %v1901_v9 }
  0x22   : > { %1692 = vmatprep.mubr.msk.bf16.mxu0 %vm1902_vm1, %v1901_v9 }
  0x23   : > { %1691 = vmatpush3.bf16.msra.mxu0 %v2024_v11 }
  0x24   : > { %1699 = vmatpush3.bf16.msra.mxu1 %v2031_v12  ;;  %1704 = vmatprep.subr.bf16.mxu0 %v1901_v9 }
  0x25   : > { %1712 = vmatprep.subr.bf16.mxu1 %v1901_v9 }
  0x27   : > { %1701 = vmatmul.mubr.msk.bf16.vlgmr.msra.gmra.mrb[4].mxu1 %vm406_vm2, %v550_v39 }
  0x28   : > { %1713 = vmatpush3.bf16.msra.mxu1 %v2021_v10  ;;  %1716 = vmatprep.mubr.msk.bf16.mxu1 %vm1902_vm1, %v1901_v9 }
  0x29   : > { %1714 = vmatprep.subr.bf16.mxu1 %v1901_v9 }
  0x2c   : > { %1715 = vmatpush3.bf16.msra.mxu1 %v2031_v12 }
  0x2d   : > { %1728 = vmatprep.subr.bf16.mxu1 %v1901_v9 }
  0x2f   : > { %1717 = vmatmul.mubr.msk.bf16.vlgmr.msra.gmra.mrb[8].mxu1 %vm406_vm2, %v673_v1 }
  0x30   : > { %1729 = vmatpush3.bf16.msra.mxu1 %v2021_v10  ;;  %1732 = vmatprep.mubr.msk.bf16.mxu1 %vm1902_vm1, %v1901_v9 }
  0x31   : > { %1730 = vmatprep.subr.bf16.mxu1 %v1901_v9 }
  0x34   : > { %1731 = vmatpush3.bf16.msra.mxu1 %v2031_v12 }
  0x35   : > { %1744 = vmatprep.subr.bf16.mxu1 %v1901_v9 }
  0xf1   : > { %v444_v16 = vpop.f32.mrb[0].mxu0 }
  0xf2   : > { %v499_v18 = vpop.f32.mrb[0].mxu1  ;;  %v1678_v19 = vpop.f32.mrb[1].mxu0 }
  0xf3   : > { %v500_v20 = vadd.f32 %v499_v18, %v444_v16  ;;  %v1686_v21 = vpop.f32.mrb[1].mxu1  ;;  %v447_v22 = vpop.f32.mrb[2].mxu0 }
  0xf4   : > { %v502_v23 = vpop.f32.mrb[2].mxu1  ;;  %v1679_v24 = vpop.f32.mrb[3].mxu0 }
  0xf5   : > { %v511_v25 = vadd.f32 %v2060_v17, %v500_v20  ;;  %v1687_v26 = vpop.f32.mrb[3].mxu1 }
  0xf7   : > { %1827 = vtanh.f32 %v511_v25  ;;  %v1574_v29 = vmul.f32 -1.442695, %v511_v25 }
  0xf9   : > { %1829 = vpow2.f32 %v1574_v29 }
  0xfa   : > { %v633_v44 = vpop.f32.mrb[4].mxu1 }
  0xfb   : > { %v1702_v45 = vpop.f32.mrb[5].mxu1 }
  0xfc   : > { %v636_v46 = vpop.f32.mrb[6].mxu1 }
  0xfd   : > { %v1703_v47 = vpop.f32.mrb[7].mxu1 }
 0x101   : > { %v1828_v27 = vpop.eup %1827 }
 0x102   : > { %525 = vrot.lane.b32.xlu0 %v1828_v27, %s1903_s21  ;;  %v756_v6 = vpop.f32.mrb[8].mxu1 }
 0x103   : > { %v1830_v30 = vpop.eup %1829  ;;  %v1718_v7 = vpop.f32.mrb[9].mxu1 }
 0x104   : > { %v515_v31 = vadd.f32 1.0, %v1830_v30  ;;  %v759_v13 = vpop.f32.mrb[10].mxu1 }
 0x105   : > { %v1719_v14 = vpop.f32.mrb[11].mxu1 }
 0x106   : > { %520 = vrot.lane.b32.xlu0 %v391_v28, %s1904_s30  ;;  %1831 = vrcp.f32 %v515_v31 }
 0x110   : > { %v1832_v32 = vpop.eup %1831 }
 0x174   : > { %v526_v33 = vpop.permute.xlu0 %525 }
 0x175   : > { %v528_v34 = vmul.f32 %v1832_v32, %v526_v33  ;;  %v796_v33 = vld [vmem:[#allocation2 + $0xc] sm:$0xf] }
 0x176   : > { %1733 = vmatmul.mubr.msk.bf16.vlgmr.msra.gmra.mrb[12].mxu1 %vm406_vm2, %v796_v33 }
 0x177   : > { %530 = vrot.lane.b32.xlu1 %v528_v34, %s1904_s30  ;;  %1745 = vmatpush3.bf16.msra.mxu1 %v2021_v10 }
 0x178   : > { %v521_v35 = vpop.permute.xlu0 %520  ;;  %1748 = vmatprep.mubr.msk.bf16.mxu1 %vm1902_vm1, %v1901_v9  ;;  %1746 = vmatprep.subr.bf16.mxu1 %v1901_v9 }
 0x179   : > { %v523_v36 = vmul.f32 %v1832_v32, %v521_v35 }
 0x17b   : > { %1747 = vmatpush3.bf16.msra.mxu1 %v2031_v12 }
 0x17c   : > { %1760 = vmatprep.subr.bf16.mxu1 %v1901_v9 }
 0x1e9   : > { %v531_v37 = vpop.permute.xlu1 %530 }
 0x1ea   : > { %v533_v38 = vadd.f32 %v531_v37, %v523_v36 }
 0x1ec   : > { %1833 = vtanh.f32 %v533_v38 }
 0x1f6   : > { %v1834_v40 = vpop.eup %1833 }
 0x1f7   : > { %536 = vrot.lane.b32.xlu1 %v1834_v40, %s1903_s21 }
 0x269   : > { %v537_v41 = vpop.permute.xlu1 %536 }
 0x26a   : > { %v539_v42 = vmul.f32 %v1832_v32, %v537_v41 }
 0x26c   : > { %v2075_v43 = vpack.c.bf16 %v539_v42, %v539_v42 }
 0x26e   : > { %551 = vrot.lane.b32.xlu0 %v2075_v43, %s1904_s30 }
 0x2e0   : > { %v552_v48 = vpop.permute.xlu0 %551 }
 0x2e1   : > { %1693 = vmatmul.mubr.msk.bf16.vlgmr.msra.gmra.mrb[4].mxu0 %vm406_vm2, %v552_v48 }
 0x2e2   : > { %1705 = vmatpush3.bf16.msra.mxu0 %v2016_v8  ;;  %1708 = vmatprep.mubr.msk.bf16.mxu0 %vm1902_vm1, %v1901_v9 }
 0x2e3   : > { %1706 = vmatprep.subr.bf16.mxu0 %v1901_v9 }
 0x2e6   : > { %1707 = vmatpush3.bf16.msra.mxu0 %v2024_v11 }
 0x2e7   : > { %1720 = vmatprep.subr.bf16.mxu0 %v1901_v9 }
 0x3b4   : > { %v590_v49 = vpop.f32.mrb[4].mxu0 }
 0x3b5   : > { %v634_v50 = vadd.f32 %v633_v44, %v590_v49  ;;  %v1694_v51 = vpop.f32.mrb[5].mxu0 }
 0x3b6   : > { %v593_v52 = vpop.f32.mrb[6].mxu0 }
 0x3b7   : > { %v639_v53 = vadd.f32 %v2060_v17, %v634_v50  ;;  %v1695_v54 = vpop.f32.mrb[7].mxu0 }
 0x3b9   : > { %1835 = vtanh.f32 %v639_v53  ;;  %v1578_v56 = vmul.f32 -1.442695, %v639_v53 }
 0x3bb   : > { %1837 = vpow2.f32 %v1578_v56 }
 0x3c3   : > { %v1836_v55 = vpop.eup %1835 }
 0x3c4   : > { %649 = vrot.lane.b32.xlu1 %v1836_v55, %s1903_s21 }
 0x3c5   : > { %v1838_v57 = vpop.eup %1837 }
 0x3c6   : > { %v643_v58 = vadd.f32 1.0, %v1838_v57 }
 0x3c8   : > { %1839 = vrcp.f32 %v643_v58 }
 0x3d2   : > { %v1840_v59 = vpop.eup %1839 }
 0x3d3   : > { %v647_v62 = vmul.f32 %v1840_v59, %v533_v38  ;;  %v879_v38 = vpop.f32.mrb[12].mxu1 }
 0x3d4   : > { %v1734_v39 = vpop.f32.mrb[13].mxu1 }
 0x3d5   : > { %v882_v40 = vpop.f32.mrb[14].mxu1 }
 0x3d6   : > { %v1735_v41 = vpop.f32.mrb[15].mxu1 }
 0x436   : > { %v650_v60 = vpop.permute.xlu1 %649 }
 0x437   : > { %v652_v61 = vmul.f32 %v1840_v59, %v650_v60  ;;  %v919_v60 = vld [vmem:[#allocation2 + $0x10] sm:$0xf] }
 0x438   : > { %1749 = vmatmul.mubr.msk.bf16.vlgmr.msra.gmra.mrb[16].mxu1 %vm406_vm2, %v919_v60 }
 0x439   : > { %654 = vrot.lane.b32.xlu0 %v652_v61, %s1904_s30  ;;  %1761 = vmatpush3.bf16.msra.mxu1 %v2021_v10 }
 0x43a   : > { %1764 = vmatprep.mubr.msk.bf16.mxu1 %vm1902_vm1, %v1901_v9  ;;  %1762 = vmatprep.subr.bf16.mxu1 %v1901_v9 }
 0x43d   : > { %1763 = vmatpush3.bf16.msra.mxu1 %v2031_v12 }
 0x43e   : > { %1776 = vmatprep.subr.bf16.mxu1 %v1901_v9 }
 0x4ab   : > { %v655_v63 = vpop.permute.xlu0 %654 }
 0x4ac   : > { %v657_v0 = vadd.f32 %v655_v63, %v647_v62 }
 0x4ae   : > { %1841 = vtanh.f32 %v657_v0 }
 0x4b8   : > { %v1842_v2 = vpop.eup %1841 }
 0x4b9   : > { %660 = vrot.lane.b32.xlu1 %v1842_v2, %s1903_s21 }
 0x50b   : > { %v1002_v1 = vpop.f32.mrb[16].mxu1 }
 0x50c   : > { %v1750_v2 = vpop.f32.mrb[17].mxu1 }
 0x52b   : > { %v661_v3 = vpop.permute.xlu1 %660 }
 0x52c   : > { %v663_v4 = vmul.f32 %v1840_v59, %v661_v3  ;;  %v1005_v3 = vpop.f32.mrb[18].mxu1 }
 0x52e   : > { %v2097_v5 = vpack.c.bf16 %v663_v4, %v663_v4  ;;  %v1751_v4 = vpop.f32.mrb[19].mxu1 }
 0x530   : > { %674 = vrot.lane.b32.xlu0 %v2097_v5, %s1904_s30 }
 0x5a2   : > { %v675_v15 = vpop.permute.xlu0 %674 }
 0x5a3   : > { %1709 = vmatmul.mubr.msk.bf16.vlgmr.msra.gmra.mrb[8].mxu0 %vm406_vm2, %v675_v15 }
 0x5a4   : > { %1721 = vmatpush3.bf16.msra.mxu0 %v2016_v8  ;;  %1724 = vmatprep.mubr.msk.bf16.mxu0 %vm1902_vm1, %v1901_v9 }
 0x5a5   : > { %1722 = vmatprep.subr.bf16.mxu0 %v1901_v9 }
 0x5a8   : > { %1723 = vmatpush3.bf16.msra.mxu0 %v2024_v11 }
 0x5a9   : > { %1736 = vmatprep.subr.bf16.mxu0 %v1901_v9 }
 0x676   : > { %v713_v16 = vpop.f32.mrb[8].mxu0 }
 0x677   : > { %v757_v18 = vadd.f32 %v756_v6, %v713_v16  ;;  %v1710_v19 = vpop.f32.mrb[9].mxu0 }
 0x678   : > { %v716_v20 = vpop.f32.mrb[10].mxu0 }
 0x679   : > { %v762_v21 = vadd.f32 %v2060_v17, %v757_v18  ;;  %v1711_v22 = vpop.f32.mrb[11].mxu0 }
 0x67b   : > { %1843 = vtanh.f32 %v762_v21  ;;  %v1582_v24 = vmul.f32 -1.442695, %v762_v21 }
 0x67d   : > { %1845 = vpow2.f32 %v1582_v24 }
 0x685   : > { %v1844_v23 = vpop.eup %1843 }
 0x686   : > { %772 = vrot.lane.b32.xlu1 %v1844_v23, %s1903_s21 }
 0x687   : > { %v1846_v25 = vpop.eup %1845 }
 0x688   : > { %v766_v26 = vadd.f32 1.0, %v1846_v25 }
 0x68a   : > { %1847 = vrcp.f32 %v766_v26 }
 0x694   : > { %v1848_v27 = vpop.eup %1847 }
 0x695   : > { %v770_v30 = vmul.f32 %v1848_v27, %v657_v0 }
 0x6f8   : > { %v773_v28 = vpop.permute.xlu1 %772 }
 0x6f9   : > { %v775_v29 = vmul.f32 %v1848_v27, %v773_v28 }
 0x6fb   : > { %777 = vrot.lane.b32.xlu0 %v775_v29, %s1904_s30  ;;  %v1042_v29 = vld [vmem:[#allocation2 + $0x14] sm:$0xf] }
 0x6fc   : > { %1765 = vmatmul.mubr.msk.bf16.vlgmr.msra.gmra.mrb[20].mxu1 %vm406_vm2, %v1042_v29 }
 0x6fd   : > { %1777 = vmatpush3.bf16.msra.mxu1 %v2021_v10  ;;  %1780 = vmatprep.mubr.msk.bf16.mxu1 %vm1902_vm1, %v1901_v9 }
 0x6fe   : > { %1778 = vmatprep.subr.bf16.mxu1 %v1901_v9 }
 0x701   : > { %1779 = vmatpush3.bf16.msra.mxu1 %v2031_v12 }
 0x702   : > { %1792 = vmatprep.subr.bf16.mxu1 %v1901_v9 }
 0x76d   : > { %v778_v31 = vpop.permute.xlu0 %777 }
 0x76e   : > { %v780_v32 = vadd.f32 %v778_v31, %v770_v30 }
 0x770   : > { %1849 = vtanh.f32 %v780_v32 }
 0x77a   : > { %v1850_v34 = vpop.eup %1849 }
 0x77b   : > { %783 = vrot.lane.b32.xlu1 %v1850_v34, %s1903_s21 }
 0x7cf   : > { %v1125_v34 = vpop.f32.mrb[20].mxu1 }
 0x7ed   : > { %v784_v35 = vpop.permute.xlu1 %783 }
 0x7ee   : > { %v786_v36 = vmul.f32 %v1848_v27, %v784_v35  ;;  %v1766_v35 = vpop.f32.mrb[21].mxu1 }
 0x7f0   : > { %v2119_v37 = vpack.c.bf16 %v786_v36, %v786_v36  ;;  %v1128_v36 = vpop.f32.mrb[22].mxu1 }
 0x7f2   : > { %797 = vrot.lane.b32.xlu0 %v2119_v37, %s1904_s30 }
 0x864   : > { %v798_v42 = vpop.permute.xlu0 %797 }
 0x865   : > { %1725 = vmatmul.mubr.msk.bf16.vlgmr.msra.gmra.mrb[12].mxu0 %vm406_vm2, %v798_v42 }
 0x866   : > { %1737 = vmatpush3.bf16.msra.mxu0 %v2016_v8  ;;  %1740 = vmatprep.mubr.msk.bf16.mxu0 %vm1902_vm1, %v1901_v9 }
 0x867   : > { %1738 = vmatprep.subr.bf16.mxu0 %v1901_v9 }
 0x86a   : > { %1739 = vmatpush3.bf16.msra.mxu0 %v2024_v11 }
 0x86b   : > { %1752 = vmatprep.subr.bf16.mxu0 %v1901_v9 }
 0x938   : > { %v836_v44 = vpop.f32.mrb[12].mxu0 }
 0x939   : > { %v880_v45 = vadd.f32 %v879_v38, %v836_v44  ;;  %v1726_v46 = vpop.f32.mrb[13].mxu0  ;;  %v1767_v38 = vpop.f32.mrb[23].mxu1 }
 0x93a   : > { %v839_v47 = vpop.f32.mrb[14].mxu0 }
 0x93b   : > { %v885_v48 = vadd.f32 %v2060_v17, %v880_v45  ;;  %v1727_v49 = vpop.f32.mrb[15].mxu0 }
 0x93d   : > { %1851 = vtanh.f32 %v885_v48  ;;  %v1586_v51 = vmul.f32 -1.442695, %v885_v48 }
 0x93f   : > { %1853 = vpow2.f32 %v1586_v51 }
 0x947   : > { %v1852_v50 = vpop.eup %1851 }
 0x948   : > { %895 = vrot.lane.b32.xlu1 %v1852_v50, %s1903_s21 }
 0x949   : > { %v1854_v52 = vpop.eup %1853 }
 0x94a   : > { %v889_v53 = vadd.f32 1.0, %v1854_v52 }
 0x94c   : > { %1855 = vrcp.f32 %v889_v53 }
 0x956   : > { %v1856_v54 = vpop.eup %1855 }
 0x957   : > { %v893_v57 = vmul.f32 %v1856_v54, %v780_v32 }
 0x9ba   : > { %v896_v55 = vpop.permute.xlu1 %895 }
 0x9bb   : > { %v898_v56 = vmul.f32 %v1856_v54, %v896_v55 }
 0x9bd   : > { %900 = vrot.lane.b32.xlu0 %v898_v56, %s1904_s30 }
 0xa2f   : > { %v901_v58 = vpop.permute.xlu0 %900 }
 0xa30   : > { %v903_v59 = vadd.f32 %v901_v58, %v893_v57  ;;  %v1165_v57 = vld [vmem:[#allocation2 + $0x18] sm:$0xf] }
 0xa31   : > { %1781 = vmatmul.mubr.msk.bf16.vlgmr.msra.gmra.mrb[24].mxu1 %vm406_vm2, %v1165_v57 }
 0xa32   : > { %1857 = vtanh.f32 %v903_v59  ;;  %1793 = vmatpush3.bf16.msra.mxu1 %v2021_v10  ;;  %1796 = vmatprep.mubr.msk.bf16.mxu1 %vm1902_vm1, %v1901_v9 }
 0xa33   : > { %1794 = vmatprep.subr.bf16.mxu1 %v1901_v9 }
 0xa36   : > { %1795 = vmatpush3.bf16.msra.mxu1 %v2031_v12 }
 0xa3c   : > { %v1858_v61 = vpop.eup %1857 }
 0xa3d   : > { %906 = vrot.lane.b32.xlu1 %v1858_v61, %s1903_s21 }
 0xaaf   : > { %v907_v62 = vpop.permute.xlu1 %906 }
 0xab0   : > { %v909_v63 = vmul.f32 %v1856_v54, %v907_v62 }
 0xab2   : > { %v2141_v0 = vpack.c.bf16 %v909_v63, %v909_v63 }
 0xab4   : > { %920 = vrot.lane.b32.xlu0 %v2141_v0, %s1904_s30 }
 0xb04   : > { %v1248_v62 = vpop.f32.mrb[24].mxu1 }
 0xb05   : > { %v1782_v63 = vpop.f32.mrb[25].mxu1 }
 0xb06   : > { %v1251_v10 = vpop.f32.mrb[26].mxu1 }
 0xb26   : > { %v921_v6 = vpop.permute.xlu0 %920 }
 0xb27   : > { %1741 = vmatmul.mubr.msk.bf16.vlgmr.msra.gmra.mrb[16].mxu0 %vm406_vm2, %v921_v6 }
 0xb28   : > { %1753 = vmatpush3.bf16.msra.mxu0 %v2016_v8  ;;  %1756 = vmatprep.mubr.msk.bf16.mxu0 %vm1902_vm1, %v1901_v9 }
 0xb29   : > { %1754 = vmatprep.subr.bf16.mxu0 %v1901_v9 }
 0xb2c   : > { %1755 = vmatpush3.bf16.msra.mxu0 %v2024_v11 }
 0xb2d   : > { %1768 = vmatprep.subr.bf16.mxu0 %v1901_v9 }
 0xbfa   : > { %v959_v7 = vpop.f32.mrb[16].mxu0 }
 0xbfb   : > { %v1003_v13 = vadd.f32 %v1002_v1, %v959_v7  ;;  %v1742_v14 = vpop.f32.mrb[17].mxu0  ;;  %v1783_v1 = vpop.f32.mrb[27].mxu1 }
 0xbfc   : > { %v962_v15 = vpop.f32.mrb[18].mxu0 }
 0xbfd   : > { %v1008_v16 = vadd.f32 %v2060_v17, %v1003_v13  ;;  %v1743_v18 = vpop.f32.mrb[19].mxu0 }
 0xbff   : > { %1859 = vtanh.f32 %v1008_v16  ;;  %v1590_v20 = vmul.f32 -1.442695, %v1008_v16 }
 0xc01   : > { %1861 = vpow2.f32 %v1590_v20 }
 0xc09   : > { %v1860_v19 = vpop.eup %1859 }
 0xc0a   : > { %1018 = vrot.lane.b32.xlu1 %v1860_v19, %s1903_s21 }
 0xc0b   : > { %v1862_v21 = vpop.eup %1861 }
 0xc0c   : > { %v1012_v22 = vadd.f32 1.0, %v1862_v21 }
 0xc0e   : > { %1863 = vrcp.f32 %v1012_v22  ;;  %v1288_v22 = vld [vmem:[#allocation2 + $0x1c] sm:$0xf] }
 0xc0f   : > { %1797 = vmatmul.mubr.msk.bf16.vlgmr.msra.gmra.mrb[28].mxu1 %vm406_vm2, %v1288_v22 }
 0xc18   : > { %v1864_v23 = vpop.eup %1863 }
 0xc19   : > { %v1016_v26 = vmul.f32 %v1864_v23, %v903_v59 }
 0xc7c   : > { %v1019_v24 = vpop.permute.xlu1 %1018 }
 0xc7d   : > { %v1021_v25 = vmul.f32 %v1864_v23, %v1019_v24 }
 0xc7f   : > { %1023 = vrot.lane.b32.xlu0 %v1021_v25, %s1904_s30 }
 0xcf1   : > { %v1024_v27 = vpop.permute.xlu0 %1023 }
 0xcf2   : > { %v1026_v28 = vadd.f32 %v1024_v27, %v1016_v26  ;;  %v1371_v27 = vpop.f32.mrb[28].mxu1 }
 0xcf4   : > { %1865 = vtanh.f32 %v1026_v28 }
 0xcfe   : > { %v1866_v30 = vpop.eup %1865 }
 0xcff   : > { %1029 = vrot.lane.b32.xlu1 %v1866_v30, %s1903_s21 }
 0xd71   : > { %v1030_v31 = vpop.permute.xlu1 %1029 }
 0xd72   : > { %v1032_v32 = vmul.f32 %v1864_v23, %v1030_v31 }
 0xd74   : > { %v2163_v33 = vpack.c.bf16 %v1032_v32, %v1032_v32 }
 0xd76   : > { %1043 = vrot.lane.b32.xlu0 %v2163_v33, %s1904_s30 }
 0xde8   : > { %v1044_v39 = vpop.permute.xlu0 %1043 }
 0xde9   : > { %1757 = vmatmul.mubr.msk.bf16.vlgmr.msra.gmra.mrb[20].mxu0 %vm406_vm2, %v1044_v39 }
 0xdea   : > { %1769 = vmatpush3.bf16.msra.mxu0 %v2016_v8  ;;  %1772 = vmatprep.mubr.msk.bf16.mxu0 %vm1902_vm1, %v1901_v9 }
 0xdeb   : > { %1770 = vmatprep.subr.bf16.mxu0 %v1901_v9 }
 0xdee   : > { %1771 = vmatpush3.bf16.msra.mxu0 %v2024_v11 }
 0xdef   : > { %1784 = vmatprep.subr.bf16.mxu0 %v1901_v9 }
 0xebc   : > { %v1082_v40 = vpop.f32.mrb[20].mxu0 }
 0xebd   : > { %v1126_v41 = vadd.f32 %v1125_v34, %v1082_v40  ;;  %v1758_v42 = vpop.f32.mrb[21].mxu0 }
 0xebe   : > { %v1085_v44 = vpop.f32.mrb[22].mxu0 }
 0xebf   : > { %v1131_v45 = vadd.f32 %v2060_v17, %v1126_v41  ;;  %v1759_v46 = vpop.f32.mrb[23].mxu0 }
 0xec1   : > { %1867 = vtanh.f32 %v1131_v45  ;;  %v1594_v48 = vmul.f32 -1.442695, %v1131_v45 }
 0xec3   : > { %1869 = vpow2.f32 %v1594_v48 }
 0xecb   : > { %v1868_v47 = vpop.eup %1867 }
 0xecc   : > { %1141 = vrot.lane.b32.xlu1 %v1868_v47, %s1903_s21 }
 0xecd   : > { %v1870_v49 = vpop.eup %1869 }
 0xece   : > { %v1135_v50 = vadd.f32 1.0, %v1870_v49 }
 0xed0   : > { %1871 = vrcp.f32 %v1135_v50 }
 0xeda   : > { %v1872_v51 = vpop.eup %1871 }
 0xedb   : > { %v1139_v54 = vmul.f32 %v1872_v51, %v1026_v28  ;;  %v1798_v28 = vpop.f32.mrb[29].mxu1 }
 0xedc   : > { %v1374_v29 = vpop.f32.mrb[30].mxu1 }
 0xedd   : > { %v1799_v30 = vpop.f32.mrb[31].mxu1 }
 0xf3e   : > { %v1142_v52 = vpop.permute.xlu1 %1141 }
 0xf3f   : > { %v1144_v53 = vmul.f32 %v1872_v51, %v1142_v52 }
 0xf41   : > { %1146 = vrot.lane.b32.xlu0 %v1144_v53, %s1904_s30 }
 0xfb3   : > { %v1147_v55 = vpop.permute.xlu0 %1146 }
 0xfb4   : > { %v1149_v56 = vadd.f32 %v1147_v55, %v1139_v54 }
 0xfb6   : > { %1873 = vtanh.f32 %v1149_v56 }
 0xfc0   : > { %v1874_v58 = vpop.eup %1873 }
 0xfc1   : > { %1152 = vrot.lane.b32.xlu1 %v1874_v58, %s1903_s21  ;;  %v1891_v58 = vld [vmem:[%s2250_s6] sm:$0xff] (!%p1604_p5)  }
0x1033   : > { %v1153_v59 = vpop.permute.xlu1 %1152 }
0x1034   : > { %v1155_v60 = vmul.f32 %v1872_v51, %v1153_v59  ;;  %v1892_v59 = vld [vmem:[%s2250_s6 + $0x8] sm:$0xff] (!%p1604_p5)  }
0x1036   : > { %v2184_v61 = vpack.c.bf16 %v1155_v60, %v1155_v60 }
0x1038   : > { %1166 = vrot.lane.b32.xlu0 %v2184_v61, %s1904_s30 }
0x10aa   : > { %v1167_v2 = vpop.permute.xlu0 %1166 }
0x10ab   : > { %1773 = vmatmul.mubr.msk.bf16.vlgmr.msra.gmra.mrb[24].mxu0 %vm406_vm2, %v1167_v2 }
0x10ac   : > { %1785 = vmatpush3.bf16.msra.mxu0 %v2016_v8  ;;  %1788 = vmatprep.mubr.msk.bf16.mxu0 %vm1902_vm1, %v1901_v9 }
0x10ad   : > { %1786 = vmatprep.subr.bf16.mxu0 %v1901_v9 }
0x10b0   : > { %1787 = vmatpush3.bf16.msra.mxu0 %v2024_v11 }
0x117e   : > { %v1205_v12 = vpop.f32.mrb[24].mxu0 }
0x117f   : > { %v1249_v3 = vadd.f32 %v1248_v62, %v1205_v12  ;;  %v1774_v4 = vpop.f32.mrb[25].mxu0 }
0x1180   : > { %v1208_v6 = vpop.f32.mrb[26].mxu0 }
0x1181   : > { %v1254_v7 = vadd.f32 %v2060_v17, %v1249_v3  ;;  %v1775_v13 = vpop.f32.mrb[27].mxu0 }
0x1183   : > { %1875 = vtanh.f32 %v1254_v7  ;;  %v1598_v15 = vmul.f32 -1.442695, %v1254_v7 }
0x1185   : > { %1877 = vpow2.f32 %v1598_v15 }
0x118d   : > { %v1876_v14 = vpop.eup %1875 }
0x118e   : > { %1264 = vrot.lane.b32.xlu1 %v1876_v14, %s1903_s21 }
0x118f   : > { %v1878_v8 = vpop.eup %1877 }
0x1190   : > { %v1258_v16 = vadd.f32 1.0, %v1878_v8 }
0x1192   : > { %1879 = vrcp.f32 %v1258_v16 }
0x119c   : > { %v1880_v18 = vpop.eup %1879 }
0x119d   : > { %v1262_v11 = vmul.f32 %v1880_v18, %v1149_v56 }
0x1200   : > { %v1265_v9 = vpop.permute.xlu1 %1264 }
0x1201   : > { %v1267_v19 = vmul.f32 %v1880_v18, %v1265_v9 }
0x1203   : > { %1269 = vrot.lane.b32.xlu0 %v1267_v19, %s1904_s30 }
0x1275   : > { %v1270_v20 = vpop.permute.xlu0 %1269 }
0x1276   : > { %v1272_v21 = vadd.f32 %v1270_v20, %v1262_v11 }
0x1278   : > { %1881 = vtanh.f32 %v1272_v21 }
0x1282   : > { %v1882_v23 = vpop.eup %1881 }
0x1283   : > { %1275 = vrot.lane.b32.xlu1 %v1882_v23, %s1903_s21 }
0x12f5   : > { %v1276_v24 = vpop.permute.xlu1 %1275 }
0x12f6   : > { %v1278_v25 = vmul.f32 %v1880_v18, %v1276_v24 }
0x12f8   : > { %v1279_v26 = vpack.c.bf16 %v1278_v25, %v1278_v25 }
0x12fa   : > { %1289 = vrot.lane.b32.xlu0 %v1279_v26, %s1904_s30 }
0x136c   : > { %v1290_v31 = vpop.permute.xlu0 %1289 }
0x136d   : > { %1789 = vmatmul.mubr.msk.bf16.vlgmr.msra.gmra.mrb[28].mxu0 %vm406_vm2, %v1290_v31 }
0x1440   : > { %v1328_v32 = vpop.f32.mrb[28].mxu0 }
0x1441   : > { %v1372_v34 = vadd.f32 %v1371_v27, %v1328_v32  ;;  %v1790_v35 = vpop.f32.mrb[29].mxu0 }
0x1442   : > { %v1331_v36 = vpop.f32.mrb[30].mxu0 }
0x1443   : > { %v1377_v38 = vadd.f32 %v2060_v17, %v1372_v34  ;;  %v1791_v39 = vpop.f32.mrb[31].mxu0 }
0x1445   : > { %1883 = vtanh.f32 %v1377_v38  ;;  %v1602_v41 = vmul.f32 -1.442695, %v1377_v38 }
0x1447   : > { %1885 = vpow2.f32 %v1602_v41 }
0x144f   : > { %v1884_v40 = vpop.eup %1883 }
0x1450   : > { %1387 = vrot.lane.b32.xlu1 %v1884_v40, %s1903_s21 }
0x1451   : > { %v1886_v42 = vpop.eup %1885 }
0x1452   : > { %v1381_v44 = vadd.f32 1.0, %v1886_v42 }
0x1454   : > { %1887 = vrcp.f32 %v1381_v44 }
0x145e   : > { %v1888_v45 = vpop.eup %1887 }
0x145f   : > { %v1385_v17 = vmul.f32 %v1888_v45, %v1272_v21 }
0x14c2   : > { %v1388_v46 = vpop.permute.xlu1 %1387 }
0x14c3   : > { %v1390_v47 = vmul.f32 %v1888_v45, %v1388_v46 }
0x14c5   : > { %1392 = vrot.lane.b32.xlu0 %v1390_v47, %s1904_s30 }
0x14c9   : > { %544 = vrot.lane.b32.xlu0 %v2075_v43, %s1904_s30 }
0x14cd   : > { %791 = vrot.lane.b32.xlu0 %v2119_v37, %s1904_s30 }
0x14d1   : > { %1037 = vrot.lane.b32.xlu0 %v2163_v33, %s1904_s30 }
0x14d5   : > { %1283 = vrot.lane.b32.xlu0 %v1279_v26, %s1904_s30 }
0x1537   : > { %v1393_v48 = vpop.permute.xlu0 %1392 }
0x1538   : > { %v1395_v49 = vadd.f32 %v1393_v48, %v1385_v17 }
0x153a   : > { %1889 = vtanh.f32 %v1395_v49 }
0x153b   : > { %v545_v50 = vpop.permute.xlu0 %544 }
0x153c   : > { %548 = vst.msk [vmem:[#allocation2] sm:$0xf] %vm547_vm3, %v545_v50 }
0x153f   : > { %v792_v51 = vpop.permute.xlu0 %791 }
0x1540   : > { %794 = vst.msk [vmem:[#allocation2 + $0x8] sm:$0xf] %vm547_vm3, %v792_v51 }
0x1543   : > { %v1038_v43 = vpop.permute.xlu0 %1037 }
0x1544   : > { %v1890_v52 = vpop.eup %1889  ;;  %1040 = vst.msk [vmem:[#allocation2 + $0x10] sm:$0xf] %vm547_vm3, %v1038_v43 }
0x1545   : > { %1398 = vrot.lane.b32.xlu1 %v1890_v52, %s1903_s21 }
0x1547   : > { %v1284_v37 = vpop.permute.xlu0 %1283 }
0x1548   : > { %1286 = vst.msk [vmem:[#allocation2 + $0x18] sm:$0xf] %vm547_vm3, %v1284_v37 }
0x1549   : > { %668 = vrot.lane.b32.xlu1 %v2097_v5, %s1904_s30 }
0x154d   : > { %914 = vrot.lane.b32.xlu1 %v2141_v0, %s1904_s30  ;;  %v1906_v0 = vmov (!%p1604_p5), 0.0  }
0x154e   : > { %1800 = vmatprep.subr.bf16.mxu0 (!%p1604_p5), %v1906_v0  ;;  %1804 = vmatprep.mubr.msk.bf16.mxu0 (!%p1604_p5), %vm1907_vm4, %v1906_v0 }
0x154f   : > { %1801 = vmatpush3.bf16.msra.mxu0 (!%p1604_p5), %v1891_v58 }
0x1550   : > { %1802 = vmatprep.subr.bf16.mxu0 (!%p1604_p5), %v1906_v0 }
0x1551   : > { %1160 = vrot.lane.b32.xlu1 %v2184_v61, %s1904_s30  ;;  %v1605_v61 = vld [vmem:[%s2251_s7] ss:$0 sm:$0xff] (!%p1604_p5) }
0x1553   : > { %1803 = vmatpush3.bf16.msra.mxu0 (!%p1604_p5), %v1892_v59 }
0x15b7   : > { %v1399_v33 = vpop.permute.xlu1 %1398 }
0x15b8   : > { %v1401_v53 = vmul.f32 %v1888_v45, %v1399_v33 }
0x15ba   : > { %v1402_v54 = vpack.c.bf16 %v1401_v53, %v1401_v53 }
0x15bb   : > { %v669_v55 = vpop.permute.xlu1 %668 }
0x15bc   : > { %671 = vst.msk [vmem:[#allocation2 + $0x4] sm:$0xf] %vm547_vm3, %v669_v55  ;;  %1406 = vrot.lane.b32.xlu1 %v1402_v54, %s1904_s30  ;;  %1425 = vrot.lane.b32.xlu0 (!%p1604_p5), %v1402_v54, %s1905_s29 }
0x15bf   : > { %v915_v56 = vpop.permute.xlu1 %914 }
0x15c0   : > { %917 = vst.msk [vmem:[#allocation2 + $0xc] sm:$0xf] %vm547_vm3, %v915_v56 }
0x15c3   : > { %v1161_v57 = vpop.permute.xlu1 %1160 }
0x15c4   : > { %1163 = vst.msk [vmem:[#allocation2 + $0x14] sm:$0xf] %vm547_vm3, %v1161_v57 }
0x1629   : > { %1413 = sbr.rel (%p1604_p5) target bundleno = 5894 (0x1706), region = 60 }
0x162e   : > { %v1407_v5 = vpop.permute.xlu1 %1406  ;;  %v1426_v60 = vpop.permute.xlu0 (!%p1604_p5), %1425 }
0x162f   : > { %1409 = vst.msk [vmem:[#allocation2 + $0x1c] sm:$0xf] %vm547_vm3, %v1407_v5  ;;  %1805 = vmatmul.mubr.msk.bf16.vlgmr.msra.gmra.mrb[0].mxu0 (!%p1604_p5), %vm406_vm2, %v1426_v60 }
0x1702   : > { %v1476_v62 = vpop.f32.mrb[0].mxu0 }
0x1703   : > { %v1477_v63 = vadd.f32 %v1605_v61, %v1476_v62  ;;  %v1806_v10 = vpop.f32.mrb[1].mxu0 }
0x1704   : > { %v1479_v1 = vpop.f32.mrb[2].mxu0 }
0x1705   : > { %1482 = vst [vmem:[%s2252_s8] sm:$0xff] %v1477_v63  ;;  %v1807_v2 = vpop.f32.mrb[3].mxu0 }
0x1706 PF: > { %s18_s27 = sadd.s32 1, %s1899_s27  }
0x1707   : > { %p15_p6 = scmp.ge.s32.totalorder %s18_s27, 4  }
0x1709   :  { %17 = sbr.rel (!%p15_p6) target bundleno = 1 (0x1), region = 105 }

</bundles_post_ra>
